<compile_context>
chip_gen: v7x
topology: tpu7x:2x2x1
jax: 0.10.0
libtpu: 0.0.40
codegen_flags: <defaults>
</compile_context>

<pallas_src>
import functools

import jax
import jax.numpy as jnp
from jax.experimental import pallas as pl
from jax.experimental.pallas import tpu as pltpu

INPUT_SIZE = 20                    # amino-acid one-hot width
MAX_LENGTH = 24                    # LSTM hidden size per direction (H)
HIDDEN = 64                        # MLP hidden size
CAT_FEATS = MAX_LENGTH * 3 * 2     # 144
NGATES = 4                         # i, f, g, o (PyTorch order)
HP = 32                            # per-gate / per-direction lane padding (24 -> 32)
STATE_LANES = 2 * HP               # 64:  [h_fwd(0:32) | h_bwd(32:64)]
GATE_LANES = 2 * NGATES * HP       # 256: [i_f,i_b,f_f,f_b,g_f,g_b,o_f,o_b] x 32


def _sigmoid(x):
    # EUP-friendly sigmoid: identical math, no full-precision divide on the chain.
    return 0.5 * jnp.tanh(0.5 * x) + 0.5


# ----------------------------------------------------------------------------
# Fused Pallas kernel: BiLSTM (3 stacked sequences, both directions) + MLP head
# ----------------------------------------------------------------------------
def _cdr3_kernel(x_ref, w_in_ref, b_ref, w_hh_ref,
                 w1p_ref, w1a_ref, w1b_ref, b1_ref, w2_ref, b2_ref,
                 out_ref, xg_ref, *, T, B, NBP):
    """x_ref: (T*NBP, 40) time-major rows [t*NBP + n]; lanes 0:20 = x[t],
    lanes 20:40 = x[T-1-t] (time-reversed copy for the backward direction).
    n-order along the stacked batch = [pep | cdr3a | cdr3b | pad].

    w_in_ref: (40, 256) fused/gate-padded input weights (fwd+bwd).
    b_ref:    (1, 256)  fused biases (b_ih + b_hh already folded).
    w_hh_ref: (64, 256) block-diagonal recurrent weights for both directions.
    w1{p,a,b}_ref: (64, 64) per-sequence head blocks (zero rows on padded lanes).
    out_ref: (B, 1).  xg_ref: (T*NBP, 256) VMEM scratch (precomputed projections).
    """
    f32 = jnp.float32

    # ---- 1. ONE input-projection matmul for both directions and all timesteps
    #      (off the serial path); bias added once here, not per step.
    xg_ref[...] = (jnp.dot(x_ref[...], w_in_ref[...], preferred_element_type=f32)
                   + b_ref[...])

    h = jnp.zeros((NBP, STATE_LANES), f32)    # [h_fwd | h_bwd]; padded lanes stay 0
    c = jnp.zeros((NBP, STATE_LANES), f32)    # [c_fwd | c_bwd]

    # ---- 2. both directions advance with ONE recurrent matmul per step
    #      (block-diagonal W_hh).  T is small & static -> fully unrolled.
    for t in range(T):
        xg_t = xg_ref[pl.ds(t * NBP, NBP), :]
        # Re-read the recurrent weights each step rather than pinning 16 vregs
        # across the whole unrolled region (vld slots are idle on this chain).
        g = xg_t + jnp.dot(h, w_hh_ref[...], preferred_element_type=f32)
        # Gate groups are contiguous 64-lane slices ([fwd|bwd] per gate).
        i_g = _sigmoid(g[:, 0 * STATE_LANES:1 * STATE_LANES])
        f_g = _sigmoid(g[:, 1 * STATE_LANES:2 * STATE_LANES])
        g_g = jnp.tanh(g[:, 2 * STATE_LANES:3 * STATE_LANES])
        o_g = _sigmoid(g[:, 3 * STATE_LANES:4 * STATE_LANES])
        c = f_g * c + i_g * g_g              # padded lanes remain exactly 0
        h = o_g * jnp.tanh(c)

    # ---- 3. head.  No lane-axis concat: w1 is split per sequence (with zero
    #      rows on the padded lanes), so each partial matmul consumes h rows in
    #      their natural layout.  dropout: eval-mode identity (see TODO above).
    hid = (jnp.dot(h[0 * B:1 * B], w1p_ref[...], preferred_element_type=f32)
           + jnp.dot(h[1 * B:2 * B], w1a_ref[...], preferred_element_type=f32)
           + jnp.dot(h[2 * B:3 * B], w1b_ref[...], preferred_element_type=f32)
           + b1_ref[...])
    hid = jnp.maximum(hid, 0.0)
    logits = jnp.dot(hid, w2_ref[...], preferred_element_type=f32) + b2_ref[...]
    out_ref[...] = _sigmoid(logits)


# ----------------------------------------------------------------------------
# One-time weight layout prep (hoisted out of the per-call path)
# ----------------------------------------------------------------------------
def prepare_params(params):
    """Transpose, fuse fwd/bwd, pad each gate to 32 lanes, build the block-diag
    recurrent weight and the per-sequence head blocks.  Gate column layout:
    [i_f, i_b, f_f, f_b, g_f, g_b, o_f, o_b], 32 lanes each (24 real + 8 zero)."""
    H = MAX_LENGTH
    f32 = jnp.float32

    w_ih = {d: jnp.asarray(params[f"w_ih_{d}"], f32).T for d in ("f", "b")}   # (20, 96)
    w_hh = {d: jnp.asarray(params[f"w_hh_{d}"], f32).T for d in ("f", "b")}   # (24, 96)
    bias = {d: jnp.asarray(params[f"b_{d}"], f32).reshape(1, 4 * H)
            for d in ("f", "b")}                                              # (1, 96)

    w_in = jnp.zeros((2 * INPUT_SIZE, GATE_LANES), f32)       # rows 0:20 fwd, 20:40 bwd
    b_cat = jnp.zeros((1, GATE_LANES), f32)
    w_hh_cat = jnp.zeros((STATE_LANES, GATE_LANES), f32)      # rows 0:32 fwd, 32:64 bwd
    for gk in range(NGATES):
        for d_idx, d in enumerate(("f", "b")):
            col0 = (2 * gk + d_idx) * HP
            gcols = slice(gk * H, (gk + 1) * H)
            w_in = w_in.at[d_idx * INPUT_SIZE:(d_idx + 1) * INPUT_SIZE,
                           col0:col0 + H].set(w_ih[d][:, gcols])
            b_cat = b_cat.at[:, col0:col0 + H].set(bias[d][:, gcols])
            w_hh_cat = w_hh_cat.at[d_idx * HP:d_idx * HP + H,
                                   col0:col0 + H].set(w_hh[d][:, gcols])

    # Head: feature order of the module is [fwd_pep|fwd_a|fwd_b|bwd_pep|bwd_a|bwd_b].
    w1t = jnp.asarray(params["w1"], f32).T                    # (144, 64)
    w1_seq = []
    for s in range(3):
        blk = jnp.zeros((STATE_LANES, HIDDEN), f32)
        blk = blk.at[0:H, :].set(w1t[s * H:(s + 1) * H, :])                 # fwd rows
        blk = blk.at[HP:HP + H, :].set(w1t[(3 + s) * H:(4 + s) * H, :])     # bwd rows
        w1_seq.append(blk)

    return {
        "w_in": w_in, "b": b_cat, "w_hh": w_hh_cat,
        "w1p": w1_seq[0], "w1a": w1_seq[1], "w1b": w1_seq[2],
        "b1": jnp.asarray(params["b1"], f32).reshape(1, HIDDEN),
        "w2": jnp.asarray(params["w2"], f32).T,               # (64, 1)
        "b2": jnp.asarray(params["b2"], f32).reshape(1, 1),
    }


# ----------------------------------------------------------------------------
# Wrapper
# ----------------------------------------------------------------------------
def cdr3_bilstm_forward(pep, cdr3a, cdr3b, prep):
    """Full CDR3_BiLSTM forward (eval mode). pep/cdr3a/cdr3b: (B, T, 20)."""
    B, T, D = pep.shape
    assert D == INPUT_SIZE
    assert cdr3a.shape == pep.shape and cdr3b.shape == pep.shape
    NB = 3 * B
    NBP = ((NB + 7) // 8) * 8       # pad stacked batch to a sublane multiple

    # Stack the 3 sequences on the batch axis (shared BiLSTM weights), pad to NBP
    # rows, go time-major, and append the time-reversed copy on the feature axis
    # so one fused matmul produces both directions' projections per row block.
    x = jnp.concatenate([pep, cdr3a, cdr3b], axis=0).astype(jnp.float32)   # (NB,T,D)
    if NBP != NB:
        x = jnp.concatenate([x, jnp.zeros((NBP - NB, T, D), jnp.float32)], axis=0)
    x_tm = jnp.transpose(x, (1, 0, 2))                                     # (T,NBP,D)
    x2 = jnp.concatenate([x_tm, x_tm[::-1]], axis=-1).reshape(T * NBP, 2 * D)

    kernel = functools.partial(_cdr3_kernel, T=T, B=B, NBP=NBP)
    vmem = pl.BlockSpec(memory_space=pltpu.MemorySpace.VMEM)
    return pl.pallas_call(
        kernel,
        out_shape=jax.ShapeDtypeStruct((B, 1), jnp.float32),
        in_specs=[vmem] * 10,
        out_specs=vmem,
        scratch_shapes=[
            pltpu.VMEM((T * NBP, GATE_LANES), jnp.float32),   # fused input projections
        ],
    )(x2, prep["w_in"], prep["b"], prep["w_hh"],
      prep["w1p"], prep["w1a"], prep["w1b"], prep["b1"], prep["w2"], prep["b2"])


# ----------------------------------------------------------------------------
# Deterministic parameter init (matches PyTorch shapes; uniform ±1/sqrt(H))
# ----------------------------------------------------------------------------
def init_params(key):
    H = MAX_LENGTH
    ks = jax.random.split(key, 12)
    bound_lstm = 1.0 / jnp.sqrt(jnp.float32(H))
    u = lambda k, shape, b: jax.random.uniform(k, shape, jnp.float32, -b, b)

    # LSTM (forward & backward directions), gate order i,f,g,o.
    w_ih_f = u(ks[0], (4 * H, INPUT_SIZE), bound_lstm)
    w_hh_f = u(ks[1], (4 * H, H), bound_lstm)
    b_f = (u(ks[2], (1, 4 * H), bound_lstm) + u(ks[3], (1, 4 * H), bound_lstm))
    w_ih_b = u(ks[4], (4 * H, INPUT_SIZE), bound_lstm)
    w_hh_b = u(ks[5], (4 * H, H), bound_lstm)
    b_b = (u(ks[6], (1, 4 * H), bound_lstm) + u(ks[7], (1, 4 * H), bound_lstm))

    # Head: Linear(144 -> 64), Linear(64 -> 1)
    b1_bound = 1.0 / jnp.sqrt(jnp.float32(CAT_FEATS))
    b2_bound = 1.0 / jnp.sqrt(jnp.float32(HIDDEN))
    w1 = u(ks[8], (HIDDEN, CAT_FEATS), b1_bound)
    b1 = u(ks[9], (1, HIDDEN), b1_bound)
    w2 = u(ks[10], (1, HIDDEN), b2_bound)
    b2 = u(ks[11], (1, 1), b2_bound)

    return dict(w_ih_f=w_ih_f, w_hh_f=w_hh_f, b_f=b_f,
                w_ih_b=w_ih_b, w_hh_b=w_hh_b, b_b=b_b,
                w1=w1, b1=b1, w2=w2, b2=b2)


# ----------------------------------------------------------------------------
# Pure-JAX reference (mirrors the PyTorch module, eval mode) for a smoke check
# ----------------------------------------------------------------------------
def _reference_forward(pep, cdr3a, cdr3b, params):
    H = MAX_LENGTH

    def lstm_dir(x, w_ih, w_hh, b, reverse):
        N, T, _ = x.shape
        h = jnp.zeros((N, H), jnp.float32)
        c = jnp.zeros((N, H), jnp.float32)
        order = range(T - 1, -1, -1) if reverse else range(T)
        for t in order:
            g = x[:, t, :] @ w_ih.T + h @ w_hh.T + b
            i = jax.nn.sigmoid(g[:, 0 * H:1 * H])
            f = jax.nn.sigmoid(g[:, 1 * H:2 * H])
            gg = jnp.tanh(g[:, 2 * H:3 * H])
            o = jax.nn.sigmoid(g[:, 3 * H:4 * H])
            c = f * c + i * gg
            h = o * jnp.tanh(c)
        return h

    def bilstm(x):
        x = x.astype(jnp.float32)
        return (lstm_dir(x, params["w_ih_f"], params["w_hh_f"], params["b_f"], False),
                lstm_dir(x, params["w_ih_b"], params["w_hh_b"], params["b_b"], True))

    hf_p, hb_p = bilstm(pep)
    hf_a, hb_a = bilstm(cdr3a)
    hf_b, hb_b = bilstm(cdr3b)
    cat = jnp.concatenate([hf_p, hf_a, hf_b, hb_p, hb_a, hb_b], axis=1)
    hid = jnp.maximum(cat @ params["w1"].T + params["b1"], 0.0)
    return jax.nn.sigmoid(hid @ params["w2"].T + params["b2"])


if __name__ == "__main__":
    key = jax.random.PRNGKey(0)
    kp, ka, kb, kw = jax.random.split(key, 4)

    B, T = 2, 8
    pep = jax.random.normal(kp, (B, T, INPUT_SIZE), jnp.float32)
    cdr3a = jax.random.normal(ka, (B, T, INPUT_SIZE), jnp.float32)
    cdr3b = jax.random.normal(kb, (B, T, INPUT_SIZE), jnp.float32)
    params = init_params(kw)

    prep = prepare_params(params)            # one-time weight layout prep
    fwd = jax.jit(cdr3_bilstm_forward)
    out = jax.block_until_ready(fwd(pep, cdr3a, cdr3b, prep))

    assert out.shape == (B, 1)
    assert bool(jnp.all((out >= 0.0) & (out <= 1.0)))

    # Loose tolerance: MXU default precision truncates f32 operands to bf16 per
    # pass, so the serial recurrence drifts slightly vs. the pure-f32 reference.
    ref = _reference_forward(pep, cdr3a, cdr3b, params)
    max_diff = float(jnp.max(jnp.abs(out - ref)))
    assert max_diff < 2e-2, f"kernel vs reference max abs diff = {max_diff}"

    print("KERNEL_OK")
</pallas_src>

<mosaic_0001>
module attributes {stable_mosaic.version = 11 : i64} {
  func.func @_cdr3_kernel(%arg0: memref<64x40xf32, #tpu.memory_space<vmem>>, %arg1: memref<40x256xf32, #tpu.memory_space<vmem>>, %arg2: memref<1x256xf32, #tpu.memory_space<vmem>>, %arg3: memref<64x256xf32, #tpu.memory_space<vmem>>, %arg4: memref<64x64xf32, #tpu.memory_space<vmem>>, %arg5: memref<64x64xf32, #tpu.memory_space<vmem>>, %arg6: memref<64x64xf32, #tpu.memory_space<vmem>>, %arg7: memref<1x64xf32, #tpu.memory_space<vmem>>, %arg8: memref<64x1xf32, #tpu.memory_space<vmem>>, %arg9: memref<1x1xf32, #tpu.memory_space<vmem>>, %arg10: memref<2x1xf32, #tpu.memory_space<vmem>>, %arg11: memref<64x256xf32, #tpu.memory_space<vmem>>) attributes {dimension_semantics = [], scalar_prefetch = 0 : i64, scratch_operands = 1 : i64, tpu.core_type = #tpu.core_type<tc>} {
    %c0 = arith.constant 0 : index
    %c0_0 = arith.constant 0 : index
    %0 = vector.load %arg0[%c0, %c0_0] : memref<64x40xf32, #tpu.memory_space<vmem>>, vector<64x40xf32>
    %c0_1 = arith.constant 0 : index
    %c0_2 = arith.constant 0 : index
    %1 = vector.load %arg1[%c0_1, %c0_2] : memref<40x256xf32, #tpu.memory_space<vmem>>, vector<40x256xf32>
    %cst = arith.constant dense<0.000000e+00> : vector<64x256xf32>
    %2 = tpu.matmul %0, %1, %cst {dimension_numbers = #tpu.dot_dimension_numbers<[1], [0], [0], [1], [0, 0, 1, 1], [], []>} : vector<64x40xf32>, vector<40x256xf32>, vector<64x256xf32> -> vector<64x256xf32>
    %c0_3 = arith.constant 0 : index
    %c0_4 = arith.constant 0 : index
    %3 = vector.load %arg2[%c0_3, %c0_4] : memref<1x256xf32, #tpu.memory_space<vmem>>, vector<1x256xf32>
    %4 = vector.broadcast %3 : vector<1x256xf32> to vector<64x256xf32>
    %5 = arith.addf %2, %4 : vector<64x256xf32>
    %c0_5 = arith.constant 0 : index
    %c0_6 = arith.constant 0 : index
    %6 = vector.load %arg11[%c0_5, %c0_6] : memref<64x256xf32, #tpu.memory_space<vmem>>, vector<64x256xf32>
    tpu.vector_store %arg11[%c0_5, %c0_6], %5 {strides = array<i32>} : memref<64x256xf32, #tpu.memory_space<vmem>>, vector<64x256xf32>,
    %cst_7 = arith.constant 0.000000e+00 : f32
    %7 = vector.broadcast %cst_7 : f32 to vector<8x64xf32>
    %cst_8 = arith.constant 0.000000e+00 : f32
    %8 = vector.broadcast %cst_8 : f32 to vector<8x64xf32>
    %c0_9 = arith.constant 0 : index
    %c0_10 = arith.constant 0 : index
    %9 = vector.load %arg11[%c0_9, %c0_10] : memref<64x256xf32, #tpu.memory_space<vmem>>, vector<8x256xf32>
    %c0_11 = arith.constant 0 : index
    %c0_12 = arith.constant 0 : index
    %10 = vector.load %arg3[%c0_11, %c0_12] : memref<64x256xf32, #tpu.memory_space<vmem>>, vector<64x256xf32>
    %cst_13 = arith.constant dense<0.000000e+00> : vector<8x256xf32>
    %11 = tpu.matmul %7, %10, %cst_13 {dimension_numbers = #tpu.dot_dimension_numbers<[1], [0], [0], [1], [0, 0, 1, 1], [], []>} : vector<8x64xf32>, vector<64x256xf32>, vector<8x256xf32> -> vector<8x256xf32>
    %12 = arith.addf %9, %11 : vector<8x256xf32>
    %13 = vector.extract_strided_slice %12 {offsets = [0, 0], sizes = [8, 64], strides = [1, 1]} : vector<8x256xf32> to vector<8x64xf32>
    %cst_14 = arith.constant 5.000000e-01 : f32
    %14 = vector.broadcast %cst_14 : f32 to vector<8x64xf32>
    %15 = arith.mulf %14, %13 : vector<8x64xf32>
    %16 = math.tanh %15 : vector<8x64xf32>
    %cst_15 = arith.constant 5.000000e-01 : f32
    %17 = vector.broadcast %cst_15 : f32 to vector<8x64xf32>
    %18 = arith.mulf %17, %16 : vector<8x64xf32>
    %cst_16 = arith.constant 5.000000e-01 : f32
    %19 = vector.broadcast %cst_16 : f32 to vector<8x64xf32>
    %20 = arith.addf %18, %19 : vector<8x64xf32>
    %21 = vector.extract_strided_slice %12 {offsets = [0, 64], sizes = [8, 64], strides = [1, 1]} : vector<8x256xf32> to vector<8x64xf32>
    %cst_17 = arith.constant 5.000000e-01 : f32
    %22 = vector.broadcast %cst_17 : f32 to vector<8x64xf32>
    %23 = arith.mulf %22, %21 : vector<8x64xf32>
    %24 = math.tanh %23 : vector<8x64xf32>
    %cst_18 = arith.constant 5.000000e-01 : f32
    %25 = vector.broadcast %cst_18 : f32 to vector<8x64xf32>
    %26 = arith.mulf %25, %24 : vector<8x64xf32>
    %cst_19 = arith.constant 5.000000e-01 : f32
    %27 = vector.broadcast %cst_19 : f32 to vector<8x64xf32>
    %28 = arith.addf %26, %27 : vector<8x64xf32>
    %29 = vector.extract_strided_slice %12 {offsets = [0, 128], sizes = [8, 64], strides = [1, 1]} : vector<8x256xf32> to vector<8x64xf32>
    %30 = math.tanh %29 : vector<8x64xf32>
    %31 = vector.extract_strided_slice %12 {offsets = [0, 192], sizes = [8, 64], strides = [1, 1]} : vector<8x256xf32> to vector<8x64xf32>
    %cst_20 = arith.constant 5.000000e-01 : f32
    %32 = vector.broadcast %cst_20 : f32 to vector<8x64xf32>
    %33 = arith.mulf %32, %31 : vector<8x64xf32>
    %34 = math.tanh %33 : vector<8x64xf32>
    %cst_21 = arith.constant 5.000000e-01 : f32
    %35 = vector.broadcast %cst_21 : f32 to vector<8x64xf32>
    %36 = arith.mulf %35, %34 : vector<8x64xf32>
    %cst_22 = arith.constant 5.000000e-01 : f32
    %37 = vector.broadcast %cst_22 : f32 to vector<8x64xf32>
    %38 = arith.addf %36, %37 : vector<8x64xf32>
    %39 = arith.mulf %28, %8 : vector<8x64xf32>
    %40 = arith.mulf %20, %30 : vector<8x64xf32>
    %41 = arith.addf %39, %40 : vector<8x64xf32>
    %42 = math.tanh %41 : vector<8x64xf32>
    %43 = arith.mulf %38, %42 : vector<8x64xf32>
    %c8 = arith.constant 8 : index
    %c0_23 = arith.constant 0 : index
    %44 = vector.load %arg11[%c8, %c0_23] : memref<64x256xf32, #tpu.memory_space<vmem>>, vector<8x256xf32>
    %c0_24 = arith.constant 0 : index
    %c0_25 = arith.constant 0 : index
    %45 = vector.load %arg3[%c0_24, %c0_25] : memref<64x256xf32, #tpu.memory_space<vmem>>, vector<64x256xf32>
    %cst_26 = arith.constant dense<0.000000e+00> : vector<8x256xf32>
    %46 = tpu.matmul %43, %45, %cst_26 {dimension_numbers = #tpu.dot_dimension_numbers<[1], [0], [0], [1], [0, 0, 1, 1], [], []>} : vector<8x64xf32>, vector<64x256xf32>, vector<8x256xf32> -> vector<8x256xf32>
    %47 = arith.addf %44, %46 : vector<8x256xf32>
    %48 = vector.extract_strided_slice %47 {offsets = [0, 0], sizes = [8, 64], strides = [1, 1]} : vector<8x256xf32> to vector<8x64xf32>
    %cst_27 = arith.constant 5.000000e-01 : f32
    %49 = vector.broadcast %cst_27 : f32 to vector<8x64xf32>
    %50 = arith.mulf %49, %48 : vector<8x64xf32>
    %51 = math.tanh %50 : vector<8x64xf32>
    %cst_28 = arith.constant 5.000000e-01 : f32
    %52 = vector.broadcast %cst_28 : f32 to vector<8x64xf32>
    %53 = arith.mulf %52, %51 : vector<8x64xf32>
    %cst_29 = arith.constant 5.000000e-01 : f32
    %54 = vector.broadcast %cst_29 : f32 to vector<8x64xf32>
    %55 = arith.addf %53, %54 : vector<8x64xf32>
    %56 = vector.extract_strided_slice %47 {offsets = [0, 64], sizes = [8, 64], strides = [1, 1]} : vector<8x256xf32> to vector<8x64xf32>
    %cst_30 = arith.constant 5.000000e-01 : f32
    %57 = vector.broadcast %cst_30 : f32 to vector<8x64xf32>
    %58 = arith.mulf %57, %56 : vector<8x64xf32>
    %59 = math.tanh %58 : vector<8x64xf32>
    %cst_31 = arith.constant 5.000000e-01 : f32
    %60 = vector.broadcast %cst_31 : f32 to vector<8x64xf32>
    %61 = arith.mulf %60, %59 : vector<8x64xf32>
    %cst_32 = arith.constant 5.000000e-01 : f32
    %62 = vector.broadcast %cst_32 : f32 to vector<8x64xf32>
    %63 = arith.addf %61, %62 : vector<8x64xf32>
    %64 = vector.extract_strided_slice %47 {offsets = [0, 128], sizes = [8, 64], strides = [1, 1]} : vector<8x256xf32> to vector<8x64xf32>
    %65 = math.tanh %64 : vector<8x64xf32>
    %66 = vector.extract_strided_slice %47 {offsets = [0, 192], sizes = [8, 64], strides = [1, 1]} : vector<8x256xf32> to vector<8x64xf32>
    %cst_33 = arith.constant 5.000000e-01 : f32
    %67 = vector.broadcast %cst_33 : f32 to vector<8x64xf32>
    %68 = arith.mulf %67, %66 : vector<8x64xf32>
    %69 = math.tanh %68 : vector<8x64xf32>
    %cst_34 = arith.constant 5.000000e-01 : f32
    %70 = vector.broadcast %cst_34 : f32 to vector<8x64xf32>
    %71 = arith.mulf %70, %69 : vector<8x64xf32>
    %cst_35 = arith.constant 5.000000e-01 : f32
    %72 = vector.broadcast %cst_35 : f32 to vector<8x64xf32>
    %73 = arith.addf %71, %72 : vector<8x64xf32>
    %74 = arith.mulf %63, %41 : vector<8x64xf32>
    %75 = arith.mulf %55, %65 : vector<8x64xf32>
    %76 = arith.addf %74, %75 : vector<8x64xf32>
    %77 = math.tanh %76 : vector<8x64xf32>
    %78 = arith.mulf %73, %77 : vector<8x64xf32>
    %c16 = arith.constant 16 : index
    %c0_36 = arith.constant 0 : index
    %79 = vector.load %arg11[%c16, %c0_36] : memref<64x256xf32, #tpu.memory_space<vmem>>, vector<8x256xf32>
    %c0_37 = arith.constant 0 : index
    %c0_38 = arith.constant 0 : index
    %80 = vector.load %arg3[%c0_37, %c0_38] : memref<64x256xf32, #tpu.memory_space<vmem>>, vector<64x256xf32>
    %cst_39 = arith.constant dense<0.000000e+00> : vector<8x256xf32>
    %81 = tpu.matmul %78, %80, %cst_39 {dimension_numbers = #tpu.dot_dimension_numbers<[1], [0], [0], [1], [0, 0, 1, 1], [], []>} : vector<8x64xf32>, vector<64x256xf32>, vector<8x256xf32> -> vector<8x256xf32>
    %82 = arith.addf %79, %81 : vector<8x256xf32>
    %83 = vector.extract_strided_slice %82 {offsets = [0, 0], sizes = [8, 64], strides = [1, 1]} : vector<8x256xf32> to vector<8x64xf32>
    %cst_40 = arith.constant 5.000000e-01 : f32
    %84 = vector.broadcast %cst_40 : f32 to vector<8x64xf32>
    %85 = arith.mulf %84, %83 : vector<8x64xf32>
    %86 = math.tanh %85 : vector<8x64xf32>
    %cst_41 = arith.constant 5.000000e-01 : f32
    %87 = vector.broadcast %cst_41 : f32 to vector<8x64xf32>
    %88 = arith.mulf %87, %86 : vector<8x64xf32>
    %cst_42 = arith.constant 5.000000e-01 : f32
    %89 = vector.broadcast %cst_42 : f32 to vector<8x64xf32>
    %90 = arith.addf %88, %89 : vector<8x64xf32>
    %91 = vector.extract_strided_slice %82 {offsets = [0, 64], sizes = [8, 64], strides = [1, 1]} : vector<8x256xf32> to vector<8x64xf32>
    %cst_43 = arith.constant 5.000000e-01 : f32
    %92 = vector.broadcast %cst_43 : f32 to vector<8x64xf32>
    %93 = arith.mulf %92, %91 : vector<8x64xf32>
    %94 = math.tanh %93 : vector<8x64xf32>
    %cst_44 = arith.constant 5.000000e-01 : f32
    %95 = vector.broadcast %cst_44 : f32 to vector<8x64xf32>
    %96 = arith.mulf %95, %94 : vector<8x64xf32>
    %cst_45 = arith.constant 5.000000e-01 : f32
    %97 = vector.broadcast %cst_45 : f32 to vector<8x64xf32>
    %98 = arith.addf %96, %97 : vector<8x64xf32>
    %99 = vector.extract_strided_slice %82 {offsets = [0, 128], sizes = [8, 64], strides = [1, 1]} : vector<8x256xf32> to vector<8x64xf32>
    %100 = math.tanh %99 : vector<8x64xf32>
    %101 = vector.extract_strided_slice %82 {offsets = [0, 192], sizes = [8, 64], strides = [1, 1]} : vector<8x256xf32> to vector<8x64xf32>
    %cst_46 = arith.constant 5.000000e-01 : f32
    %102 = vector.broadcast %cst_46 : f32 to vector<8x64xf32>
    %103 = arith.mulf %102, %101 : vector<8x64xf32>
    %104 = math.tanh %103 : vector<8x64xf32>
    %cst_47 = arith.constant 5.000000e-01 : f32
    %105 = vector.broadcast %cst_47 : f32 to vector<8x64xf32>
    %106 = arith.mulf %105, %104 : vector<8x64xf32>
    %cst_48 = arith.constant 5.000000e-01 : f32
    %107 = vector.broadcast %cst_48 : f32 to vector<8x64xf32>
    %108 = arith.addf %106, %107 : vector<8x64xf32>
    %109 = arith.mulf %98, %76 : vector<8x64xf32>
    %110 = arith.mulf %90, %100 : vector<8x64xf32>
    %111 = arith.addf %109, %110 : vector<8x64xf32>
    %112 = math.tanh %111 : vector<8x64xf32>
    %113 = arith.mulf %108, %112 : vector<8x64xf32>
    %c24 = arith.constant 24 : index
    %c0_49 = arith.constant 0 : index
    %114 = vector.load %arg11[%c24, %c0_49] : memref<64x256xf32, #tpu.memory_space<vmem>>, vector<8x256xf32>
    %c0_50 = arith.constant 0 : index
    %c0_51 = arith.constant 0 : index
    %115 = vector.load %arg3[%c0_50, %c0_51] : memref<64x256xf32, #tpu.memory_space<vmem>>, vector<64x256xf32>
    %cst_52 = arith.constant dense<0.000000e+00> : vector<8x256xf32>
    %116 = tpu.matmul %113, %115, %cst_52 {dimension_numbers = #tpu.dot_dimension_numbers<[1], [0], [0], [1], [0, 0, 1, 1], [], []>} : vector<8x64xf32>, vector<64x256xf32>, vector<8x256xf32> -> vector<8x256xf32>
    %117 = arith.addf %114, %116 : vector<8x256xf32>
    %118 = vector.extract_strided_slice %117 {offsets = [0, 0], sizes = [8, 64], strides = [1, 1]} : vector<8x256xf32> to vector<8x64xf32>
    %cst_53 = arith.constant 5.000000e-01 : f32
    %119 = vector.broadcast %cst_53 : f32 to vector<8x64xf32>
    %120 = arith.mulf %119, %118 : vector<8x64xf32>
    %121 = math.tanh %120 : vector<8x64xf32>
    %cst_54 = arith.constant 5.000000e-01 : f32
    %122 = vector.broadcast %cst_54 : f32 to vector<8x64xf32>
    %123 = arith.mulf %122, %121 : vector<8x64xf32>
    %cst_55 = arith.constant 5.000000e-01 : f32
    %124 = vector.broadcast %cst_55 : f32 to vector<8x64xf32>
    %125 = arith.addf %123, %124 : vector<8x64xf32>
    %126 = vector.extract_strided_slice %117 {offsets = [0, 64], sizes = [8, 64], strides = [1, 1]} : vector<8x256xf32> to vector<8x64xf32>
    %cst_56 = arith.constant 5.000000e-01 : f32
    %127 = vector.broadcast %cst_56 : f32 to vector<8x64xf32>
    %128 = arith.mulf %127, %126 : vector<8x64xf32>
    %129 = math.tanh %128 : vector<8x64xf32>
    %cst_57 = arith.constant 5.000000e-01 : f32
    %130 = vector.broadcast %cst_57 : f32 to vector<8x64xf32>
    %131 = arith.mulf %130, %129 : vector<8x64xf32>
    %cst_58 = arith.constant 5.000000e-01 : f32
    %132 = vector.broadcast %cst_58 : f32 to vector<8x64xf32>
    %133 = arith.addf %131, %132 : vector<8x64xf32>
    %134 = vector.extract_strided_slice %117 {offsets = [0, 128], sizes = [8, 64], strides = [1, 1]} : vector<8x256xf32> to vector<8x64xf32>
    %135 = math.tanh %134 : vector<8x64xf32>
    %136 = vector.extract_strided_slice %117 {offsets = [0, 192], sizes = [8, 64], strides = [1, 1]} : vector<8x256xf32> to vector<8x64xf32>
    %cst_59 = arith.constant 5.000000e-01 : f32
    %137 = vector.broadcast %cst_59 : f32 to vector<8x64xf32>
    %138 = arith.mulf %137, %136 : vector<8x64xf32>
    %139 = math.tanh %138 : vector<8x64xf32>
    %cst_60 = arith.constant 5.000000e-01 : f32
    %140 = vector.broadcast %cst_60 : f32 to vector<8x64xf32>
    %141 = arith.mulf %140, %139 : vector<8x64xf32>
    %cst_61 = arith.constant 5.000000e-01 : f32
    %142 = vector.broadcast %cst_61 : f32 to vector<8x64xf32>
    %143 = arith.addf %141, %142 : vector<8x64xf32>
    %144 = arith.mulf %133, %111 : vector<8x64xf32>
    %145 = arith.mulf %125, %135 : vector<8x64xf32>
    %146 = arith.addf %144, %145 : vector<8x64xf32>
    %147 = math.tanh %146 : vector<8x64xf32>
    %148 = arith.mulf %143, %147 : vector<8x64xf32>
    %c32 = arith.constant 32 : index
    %c0_62 = arith.constant 0 : index
    %149 = vector.load %arg11[%c32, %c0_62] : memref<64x256xf32, #tpu.memory_space<vmem>>, vector<8x256xf32>
    %c0_63 = arith.constant 0 : index
    %c0_64 = arith.constant 0 : index
    %150 = vector.load %arg3[%c0_63, %c0_64] : memref<64x256xf32, #tpu.memory_space<vmem>>, vector<64x256xf32>
    %cst_65 = arith.constant dense<0.000000e+00> : vector<8x256xf32>
    %151 = tpu.matmul %148, %150, %cst_65 {dimension_numbers = #tpu.dot_dimension_numbers<[1], [0], [0], [1], [0, 0, 1, 1], [], []>} : vector<8x64xf32>, vector<64x256xf32>, vector<8x256xf32> -> vector<8x256xf32>
    %152 = arith.addf %149, %151 : vector<8x256xf32>
    %153 = vector.extract_strided_slice %152 {offsets = [0, 0], sizes = [8, 64], strides = [1, 1]} : vector<8x256xf32> to vector<8x64xf32>
    %cst_66 = arith.constant 5.000000e-01 : f32
    %154 = vector.broadcast %cst_66 : f32 to vector<8x64xf32>
    %155 = arith.mulf %154, %153 : vector<8x64xf32>
    %156 = math.tanh %155 : vector<8x64xf32>
    %cst_67 = arith.constant 5.000000e-01 : f32
    %157 = vector.broadcast %cst_67 : f32 to vector<8x64xf32>
    %158 = arith.mulf %157, %156 : vector<8x64xf32>
    %cst_68 = arith.constant 5.000000e-01 : f32
    %159 = vector.broadcast %cst_68 : f32 to vector<8x64xf32>
    %160 = arith.addf %158, %159 : vector<8x64xf32>
    %161 = vector.extract_strided_slice %152 {offsets = [0, 64], sizes = [8, 64], strides = [1, 1]} : vector<8x256xf32> to vector<8x64xf32>
    %cst_69 = arith.constant 5.000000e-01 : f32
    %162 = vector.broadcast %cst_69 : f32 to vector<8x64xf32>
    %163 = arith.mulf %162, %161 : vector<8x64xf32>
    %164 = math.tanh %163 : vector<8x64xf32>
    %cst_70 = arith.constant 5.000000e-01 : f32
    %165 = vector.broadcast %cst_70 : f32 to vector<8x64xf32>
    %166 = arith.mulf %165, %164 : vector<8x64xf32>
    %cst_71 = arith.constant 5.000000e-01 : f32
    %167 = vector.broadcast %cst_71 : f32 to vector<8x64xf32>
    %168 = arith.addf %166, %167 : vector<8x64xf32>
    %169 = vector.extract_strided_slice %152 {offsets = [0, 128], sizes = [8, 64], strides = [1, 1]} : vector<8x256xf32> to vector<8x64xf32>
    %170 = math.tanh %169 : vector<8x64xf32>
    %171 = vector.extract_strided_slice %152 {offsets = [0, 192], sizes = [8, 64], strides = [1, 1]} : vector<8x256xf32> to vector<8x64xf32>
    %cst_72 = arith.constant 5.000000e-01 : f32
    %172 = vector.broadcast %cst_72 : f32 to vector<8x64xf32>
    %173 = arith.mulf %172, %171 : vector<8x64xf32>
    %174 = math.tanh %173 : vector<8x64xf32>
    %cst_73 = arith.constant 5.000000e-01 : f32
    %175 = vector.broadcast %cst_73 : f32 to vector<8x64xf32>
    %176 = arith.mulf %175, %174 : vector<8x64xf32>
    %cst_74 = arith.constant 5.000000e-01 : f32
    %177 = vector.broadcast %cst_74 : f32 to vector<8x64xf32>
    %178 = arith.addf %176, %177 : vector<8x64xf32>
    %179 = arith.mulf %168, %146 : vector<8x64xf32>
    %180 = arith.mulf %160, %170 : vector<8x64xf32>
    %181 = arith.addf %179, %180 : vector<8x64xf32>
    %182 = math.tanh %181 : vector<8x64xf32>
    %183 = arith.mulf %178, %182 : vector<8x64xf32>
    %c40 = arith.constant 40 : index
    %c0_75 = arith.constant 0 : index
    %184 = vector.load %arg11[%c40, %c0_75] : memref<64x256xf32, #tpu.memory_space<vmem>>, vector<8x256xf32>
    %c0_76 = arith.constant 0 : index
    %c0_77 = arith.constant 0 : index
    %185 = vector.load %arg3[%c0_76, %c0_77] : memref<64x256xf32, #tpu.memory_space<vmem>>, vector<64x256xf32>
    %cst_78 = arith.constant dense<0.000000e+00> : vector<8x256xf32>
    %186 = tpu.matmul %183, %185, %cst_78 {dimension_numbers = #tpu.dot_dimension_numbers<[1], [0], [0], [1], [0, 0, 1, 1], [], []>} : vector<8x64xf32>, vector<64x256xf32>, vector<8x256xf32> -> vector<8x256xf32>
    %187 = arith.addf %184, %186 : vector<8x256xf32>
    %188 = vector.extract_strided_slice %187 {offsets = [0, 0], sizes = [8, 64], strides = [1, 1]} : vector<8x256xf32> to vector<8x64xf32>
    %cst_79 = arith.constant 5.000000e-01 : f32
    %189 = vector.broadcast %cst_79 : f32 to vector<8x64xf32>
    %190 = arith.mulf %189, %188 : vector<8x64xf32>
    %191 = math.tanh %190 : vector<8x64xf32>
    %cst_80 = arith.constant 5.000000e-01 : f32
    %192 = vector.broadcast %cst_80 : f32 to vector<8x64xf32>
    %193 = arith.mulf %192, %191 : vector<8x64xf32>
    %cst_81 = arith.constant 5.000000e-01 : f32
    %194 = vector.broadcast %cst_81 : f32 to vector<8x64xf32>
    %195 = arith.addf %193, %194 : vector<8x64xf32>
    %196 = vector.extract_strided_slice %187 {offsets = [0, 64], sizes = [8, 64], strides = [1, 1]} : vector<8x256xf32> to vector<8x64xf32>
    %cst_82 = arith.constant 5.000000e-01 : f32
    %197 = vector.broadcast %cst_82 : f32 to vector<8x64xf32>
    %198 = arith.mulf %197, %196 : vector<8x64xf32>
    %199 = math.tanh %198 : vector<8x64xf32>
    %cst_83 = arith.constant 5.000000e-01 : f32
    %200 = vector.broadcast %cst_83 : f32 to vector<8x64xf32>
    %201 = arith.mulf %200, %199 : vector<8x64xf32>
    %cst_84 = arith.constant 5.000000e-01 : f32
    %202 = vector.broadcast %cst_84 : f32 to vector<8x64xf32>
    %203 = arith.addf %201, %202 : vector<8x64xf32>
    %204 = vector.extract_strided_slice %187 {offsets = [0, 128], sizes = [8, 64], strides = [1, 1]} : vector<8x256xf32> to vector<8x64xf32>
    %205 = math.tanh %204 : vector<8x64xf32>
    %206 = vector.extract_strided_slice %187 {offsets = [0, 192], sizes = [8, 64], strides = [1, 1]} : vector<8x256xf32> to vector<8x64xf32>
    %cst_85 = arith.constant 5.000000e-01 : f32
    %207 = vector.broadcast %cst_85 : f32 to vector<8x64xf32>
    %208 = arith.mulf %207, %206 : vector<8x64xf32>
    %209 = math.tanh %208 : vector<8x64xf32>
    %cst_86 = arith.constant 5.000000e-01 : f32
    %210 = vector.broadcast %cst_86 : f32 to vector<8x64xf32>
    %211 = arith.mulf %210, %209 : vector<8x64xf32>
    %cst_87 = arith.constant 5.000000e-01 : f32
    %212 = vector.broadcast %cst_87 : f32 to vector<8x64xf32>
    %213 = arith.addf %211, %212 : vector<8x64xf32>
    %214 = arith.mulf %203, %181 : vector<8x64xf32>
    %215 = arith.mulf %195, %205 : vector<8x64xf32>
    %216 = arith.addf %214, %215 : vector<8x64xf32>
    %217 = math.tanh %216 : vector<8x64xf32>
    %218 = arith.mulf %213, %217 : vector<8x64xf32>
    %c48 = arith.constant 48 : index
    %c0_88 = arith.constant 0 : index
    %219 = vector.load %arg11[%c48, %c0_88] : memref<64x256xf32, #tpu.memory_space<vmem>>, vector<8x256xf32>
    %c0_89 = arith.constant 0 : index
    %c0_90 = arith.constant 0 : index
    %220 = vector.load %arg3[%c0_89, %c0_90] : memref<64x256xf32, #tpu.memory_space<vmem>>, vector<64x256xf32>
    %cst_91 = arith.constant dense<0.000000e+00> : vector<8x256xf32>
    %221 = tpu.matmul %218, %220, %cst_91 {dimension_numbers = #tpu.dot_dimension_numbers<[1], [0], [0], [1], [0, 0, 1, 1], [], []>} : vector<8x64xf32>, vector<64x256xf32>, vector<8x256xf32> -> vector<8x256xf32>
    %222 = arith.addf %219, %221 : vector<8x256xf32>
    %223 = vector.extract_strided_slice %222 {offsets = [0, 0], sizes = [8, 64], strides = [1, 1]} : vector<8x256xf32> to vector<8x64xf32>
    %cst_92 = arith.constant 5.000000e-01 : f32
    %224 = vector.broadcast %cst_92 : f32 to vector<8x64xf32>
    %225 = arith.mulf %224, %223 : vector<8x64xf32>
    %226 = math.tanh %225 : vector<8x64xf32>
    %cst_93 = arith.constant 5.000000e-01 : f32
    %227 = vector.broadcast %cst_93 : f32 to vector<8x64xf32>
    %228 = arith.mulf %227, %226 : vector<8x64xf32>
    %cst_94 = arith.constant 5.000000e-01 : f32
    %229 = vector.broadcast %cst_94 : f32 to vector<8x64xf32>
    %230 = arith.addf %228, %229 : vector<8x64xf32>
    %231 = vector.extract_strided_slice %222 {offsets = [0, 64], sizes = [8, 64], strides = [1, 1]} : vector<8x256xf32> to vector<8x64xf32>
    %cst_95 = arith.constant 5.000000e-01 : f32
    %232 = vector.broadcast %cst_95 : f32 to vector<8x64xf32>
    %233 = arith.mulf %232, %231 : vector<8x64xf32>
    %234 = math.tanh %233 : vector<8x64xf32>
    %cst_96 = arith.constant 5.000000e-01 : f32
    %235 = vector.broadcast %cst_96 : f32 to vector<8x64xf32>
    %236 = arith.mulf %235, %234 : vector<8x64xf32>
    %cst_97 = arith.constant 5.000000e-01 : f32
    %237 = vector.broadcast %cst_97 : f32 to vector<8x64xf32>
    %238 = arith.addf %236, %237 : vector<8x64xf32>
    %239 = vector.extract_strided_slice %222 {offsets = [0, 128], sizes = [8, 64], strides = [1, 1]} : vector<8x256xf32> to vector<8x64xf32>
    %240 = math.tanh %239 : vector<8x64xf32>
    %241 = vector.extract_strided_slice %222 {offsets = [0, 192], sizes = [8, 64], strides = [1, 1]} : vector<8x256xf32> to vector<8x64xf32>
    %cst_98 = arith.constant 5.000000e-01 : f32
    %242 = vector.broadcast %cst_98 : f32 to vector<8x64xf32>
    %243 = arith.mulf %242, %241 : vector<8x64xf32>
    %244 = math.tanh %243 : vector<8x64xf32>
    %cst_99 = arith.constant 5.000000e-01 : f32
    %245 = vector.broadcast %cst_99 : f32 to vector<8x64xf32>
    %246 = arith.mulf %245, %244 : vector<8x64xf32>
    %cst_100 = arith.constant 5.000000e-01 : f32
    %247 = vector.broadcast %cst_100 : f32 to vector<8x64xf32>
    %248 = arith.addf %246, %247 : vector<8x64xf32>
    %249 = arith.mulf %238, %216 : vector<8x64xf32>
    %250 = arith.mulf %230, %240 : vector<8x64xf32>
    %251 = arith.addf %249, %250 : vector<8x64xf32>
    %252 = math.tanh %251 : vector<8x64xf32>
    %253 = arith.mulf %248, %252 : vector<8x64xf32>
    %c56 = arith.constant 56 : index
    %c0_101 = arith.constant 0 : index
    %254 = vector.load %arg11[%c56, %c0_101] : memref<64x256xf32, #tpu.memory_space<vmem>>, vector<8x256xf32>
    %c0_102 = arith.constant 0 : index
    %c0_103 = arith.constant 0 : index
    %255 = vector.load %arg3[%c0_102, %c0_103] : memref<64x256xf32, #tpu.memory_space<vmem>>, vector<64x256xf32>
    %cst_104 = arith.constant dense<0.000000e+00> : vector<8x256xf32>
    %256 = tpu.matmul %253, %255, %cst_104 {dimension_numbers = #tpu.dot_dimension_numbers<[1], [0], [0], [1], [0, 0, 1, 1], [], []>} : vector<8x64xf32>, vector<64x256xf32>, vector<8x256xf32> -> vector<8x256xf32>
    %257 = arith.addf %254, %256 : vector<8x256xf32>
    %258 = vector.extract_strided_slice %257 {offsets = [0, 0], sizes = [8, 64], strides = [1, 1]} : vector<8x256xf32> to vector<8x64xf32>
    %cst_105 = arith.constant 5.000000e-01 : f32
    %259 = vector.broadcast %cst_105 : f32 to vector<8x64xf32>
    %260 = arith.mulf %259, %258 : vector<8x64xf32>
    %261 = math.tanh %260 : vector<8x64xf32>
    %cst_106 = arith.constant 5.000000e-01 : f32
    %262 = vector.broadcast %cst_106 : f32 to vector<8x64xf32>
    %263 = arith.mulf %262, %261 : vector<8x64xf32>
    %cst_107 = arith.constant 5.000000e-01 : f32
    %264 = vector.broadcast %cst_107 : f32 to vector<8x64xf32>
    %265 = arith.addf %263, %264 : vector<8x64xf32>
    %266 = vector.extract_strided_slice %257 {offsets = [0, 64], sizes = [8, 64], strides = [1, 1]} : vector<8x256xf32> to vector<8x64xf32>
    %cst_108 = arith.constant 5.000000e-01 : f32
    %267 = vector.broadcast %cst_108 : f32 to vector<8x64xf32>
    %268 = arith.mulf %267, %266 : vector<8x64xf32>
    %269 = math.tanh %268 : vector<8x64xf32>
    %cst_109 = arith.constant 5.000000e-01 : f32
    %270 = vector.broadcast %cst_109 : f32 to vector<8x64xf32>
    %271 = arith.mulf %270, %269 : vector<8x64xf32>
    %cst_110 = arith.constant 5.000000e-01 : f32
    %272 = vector.broadcast %cst_110 : f32 to vector<8x64xf32>
    %273 = arith.addf %271, %272 : vector<8x64xf32>
    %274 = vector.extract_strided_slice %257 {offsets = [0, 128], sizes = [8, 64], strides = [1, 1]} : vector<8x256xf32> to vector<8x64xf32>
    %275 = math.tanh %274 : vector<8x64xf32>
    %276 = vector.extract_strided_slice %257 {offsets = [0, 192], sizes = [8, 64], strides = [1, 1]} : vector<8x256xf32> to vector<8x64xf32>
    %cst_111 = arith.constant 5.000000e-01 : f32
    %277 = vector.broadcast %cst_111 : f32 to vector<8x64xf32>
    %278 = arith.mulf %277, %276 : vector<8x64xf32>
    %279 = math.tanh %278 : vector<8x64xf32>
    %cst_112 = arith.constant 5.000000e-01 : f32
    %280 = vector.broadcast %cst_112 : f32 to vector<8x64xf32>
    %281 = arith.mulf %280, %279 : vector<8x64xf32>
    %cst_113 = arith.constant 5.000000e-01 : f32
    %282 = vector.broadcast %cst_113 : f32 to vector<8x64xf32>
    %283 = arith.addf %281, %282 : vector<8x64xf32>
    %284 = arith.mulf %273, %251 : vector<8x64xf32>
    %285 = arith.mulf %265, %275 : vector<8x64xf32>
    %286 = arith.addf %284, %285 : vector<8x64xf32>
    %287 = math.tanh %286 : vector<8x64xf32>
    %288 = arith.mulf %283, %287 : vector<8x64xf32>
    %289 = vector.extract_strided_slice %288 {offsets = [0, 0], sizes = [2, 64], strides = [1, 1]} : vector<8x64xf32> to vector<2x64xf32>
    %c0_114 = arith.constant 0 : index
    %c0_115 = arith.constant 0 : index
    %290 = vector.load %arg4[%c0_114, %c0_115] : memref<64x64xf32, #tpu.memory_space<vmem>>, vector<64x64xf32>
    %cst_116 = arith.constant dense<0.000000e+00> : vector<2x64xf32>
    %291 = tpu.matmul %289, %290, %cst_116 {dimension_numbers = #tpu.dot_dimension_numbers<[1], [0], [0], [1], [0, 0, 1, 1], [], []>} : vector<2x64xf32>, vector<64x64xf32>, vector<2x64xf32> -> vector<2x64xf32>
    %292 = vector.extract_strided_slice %288 {offsets = [2, 0], sizes = [2, 64], strides = [1, 1]} : vector<8x64xf32> to vector<2x64xf32>
    %c0_117 = arith.constant 0 : index
    %c0_118 = arith.constant 0 : index
    %293 = vector.load %arg5[%c0_117, %c0_118] : memref<64x64xf32, #tpu.memory_space<vmem>>, vector<64x64xf32>
    %cst_119 = arith.constant dense<0.000000e+00> : vector<2x64xf32>
    %294 = tpu.matmul %292, %293, %cst_119 {dimension_numbers = #tpu.dot_dimension_numbers<[1], [0], [0], [1], [0, 0, 1, 1], [], []>} : vector<2x64xf32>, vector<64x64xf32>, vector<2x64xf32> -> vector<2x64xf32>
    %295 = arith.addf %291, %294 : vector<2x64xf32>
    %296 = vector.extract_strided_slice %288 {offsets = [4, 0], sizes = [2, 64], strides = [1, 1]} : vector<8x64xf32> to vector<2x64xf32>
    %c0_120 = arith.constant 0 : index
    %c0_121 = arith.constant 0 : index
    %297 = vector.load %arg6[%c0_120, %c0_121] : memref<64x64xf32, #tpu.memory_space<vmem>>, vector<64x64xf32>
    %cst_122 = arith.constant dense<0.000000e+00> : vector<2x64xf32>
    %298 = tpu.matmul %296, %297, %cst_122 {dimension_numbers = #tpu.dot_dimension_numbers<[1], [0], [0], [1], [0, 0, 1, 1], [], []>} : vector<2x64xf32>, vector<64x64xf32>, vector<2x64xf32> -> vector<2x64xf32>
    %299 = arith.addf %295, %298 : vector<2x64xf32>
    %c0_123 = arith.constant 0 : index
    %c0_124 = arith.constant 0 : index
    %300 = vector.load %arg7[%c0_123, %c0_124] : memref<1x64xf32, #tpu.memory_space<vmem>>, vector<1x64xf32>
    %301 = vector.broadcast %300 : vector<1x64xf32> to vector<2x64xf32>
    %302 = arith.addf %299, %301 : vector<2x64xf32>
    %cst_125 = arith.constant 0.000000e+00 : f32
    %303 = vector.broadcast %cst_125 : f32 to vector<2x64xf32>
    %304 = arith.maximumf %302, %303 : vector<2x64xf32>
    %c0_126 = arith.constant 0 : index
    %c0_127 = arith.constant 0 : index
    %305 = vector.load %arg8[%c0_126, %c0_127] : memref<64x1xf32, #tpu.memory_space<vmem>>, vector<64x1xf32>
    %cst_128 = arith.constant dense<0.000000e+00> : vector<2x1xf32>
    %306 = tpu.matmul %304, %305, %cst_128 {dimension_numbers = #tpu.dot_dimension_numbers<[1], [0], [0], [1], [0, 0, 1, 1], [], []>} : vector<2x64xf32>, vector<64x1xf32>, vector<2x1xf32> -> vector<2x1xf32>
    %c0_129 = arith.constant 0 : index
    %c0_130 = arith.constant 0 : index
    %307 = vector.load %arg9[%c0_129, %c0_130] : memref<1x1xf32, #tpu.memory_space<vmem>>, vector<1x1xf32>
    %308 = vector.broadcast %307 : vector<1x1xf32> to vector<2x1xf32>
    %309 = arith.addf %306, %308 : vector<2x1xf32>
    %cst_131 = arith.constant 5.000000e-01 : f32
    %310 = vector.broadcast %cst_131 : f32 to vector<2x1xf32>
    %311 = arith.mulf %310, %309 : vector<2x1xf32>
    %312 = math.tanh %311 : vector<2x1xf32>
    %cst_132 = arith.constant 5.000000e-01 : f32
    %313 = vector.broadcast %cst_132 : f32 to vector<2x1xf32>
    %314 = arith.mulf %313, %312 : vector<2x1xf32>
    %cst_133 = arith.constant 5.000000e-01 : f32
    %315 = vector.broadcast %cst_133 : f32 to vector<2x1xf32>
    %316 = arith.addf %314, %315 : vector<2x1xf32>
    %c0_134 = arith.constant 0 : index
    %c0_135 = arith.constant 0 : index
    %317 = vector.load %arg10[%c0_134, %c0_135] : memref<2x1xf32, #tpu.memory_space<vmem>>, vector<2x1xf32>
    tpu.vector_store %arg10[%c0_134, %c0_135], %316 {strides = array<i32>} : memref<2x1xf32, #tpu.memory_space<vmem>>, vector<2x1xf32>,
    return
  }
}

</mosaic_0001>

<bundles_post_ra>
// kernel: cdr3_bilstm_forward.1
= control target key start
LH: loop header
LB: loop body
LE: loop exit
PB: predicated region body
PF: predicated region fallthrough
CT: control target
= control target key end

     0   :  { %v1796_v3 = vmov 0.0   ;;  %vm67_vm0 = vcmask 326656   ;;  %v57_v47 = vlaneseq  ;;  %vm239_vm1 = vcmask 523264   ;;  %s2265_s1 = inlined_call_operand.vmem [shape: f32[40,256], index: 1, kind: input, shape index: {}]   ;;  %s2266_s3 = inlined_call_operand.vmem [shape: f32[64,256], index: 3, kind: input, shape index: {}]   ;;  %s2267_s0 = inlined_call_operand.vmem [shape: f32[64,40], index: 0, kind: input, shape index: {}]   ;;  %s2268_s2 = inlined_call_operand.vmem [shape: f32[1,256], index: 2, kind: input, shape index: {}]   ;;  %s2269_s5 = inlined_call_operand.vmem [shape: f32[64,64], index: 5, kind: input, shape index: {}]   ;;  %s2270_s4 = inlined_call_operand.vmem [shape: f32[64,64], index: 4, kind: input, shape index: {}]   ;;  %s2271_s6 = inlined_call_operand.vmem [shape: f32[64,64], index: 6, kind: input, shape index: {}]   ;;  %s2272_s8 = inlined_call_operand.vmem [shape: f32[64,1], index: 8, kind: input, shape index: {}]   ;;  %s2273_s9 = inlined_call_operand.<no memory space> [shape: f32[1,1], index: 9, kind: input, shape index: {}]   ;;  %s2274_s7 = inlined_call_operand.vmem [shape: f32[1,64], index: 7, kind: input, shape index: {}]   ;;  %s2275_s10 = inlined_call_operand.vmem [shape: f32[2,1], index: 10, kind: output, shape index: {}]  }
   0x1   :  { %v46_v0 = vld [vmem:[%s2265_s1 + $0x8] sm:$0xff]  ;;  %v48_v1 = vld [vmem:[%s2265_s1 + $0x18] sm:$0xff]  ;;  %v45_v2 = vld [vmem:[%s2265_s1] sm:$0xff]  ;;  %156 = vmatprep.mubr.f32.mxu1 %v1796_v3  ;;  %405 = vmatprep.mubr.f32.mxu0 %v1796_v3  ;;  %vm1799_vm2 = vmmov 0   ;;  %vm1371_vm3 = vcmask 1024  }
   0x2   :  { %v1510_v4 = vpack.c.bf16 %v48_v1, %v46_v0  ;;  %v47_v5 = vld [vmem:[%s2265_s1 + $0x10] sm:$0xff]  ;;  %v50_v6 = vld [vmem:[%s2265_s1 + $0x28] sm:$0xff]  ;;  %v52_v7 = vld [vmem:[%s2265_s1 + $0x38] sm:$0xff]  ;;  %v58_v48 = vshrl.u32 %v57_v47, 7 }
   0x3   :  { %v1512_v8 = vpack.c.bf16 %v47_v5, %v45_v2  ;;  %v1514_v9 = vpack.c.bf16 %v52_v7, %v50_v6  ;;  %v49_v10 = vld [vmem:[%s2265_s1 + $0x20] sm:$0xff]  ;;  %v51_v11 = vld [vmem:[%s2265_s1 + $0x30] sm:$0xff]  ;;  %v224_v12 = vld [vmem:[%s2266_s3 + $0x8] sm:$0xff] }
   0x4   :  { %1511 = vmatprep.subr.bf16.mxu1 %v1510_v4  ;;  %v1516_v13 = vpack.c.bf16 %v51_v11, %v49_v10  ;;  %v226_v14 = vld [vmem:[%s2266_s3 + $0x18] sm:$0xff]  ;;  %v223_v15 = vld [vmem:[%s2266_s3] sm:$0xff]  ;;  %v225_v16 = vld [vmem:[%s2266_s3 + $0x10] sm:$0xff]  ;;  %v59_v49 = vsub.s32 0, %v58_v48  ;;  %v63_v51 = vsub.s32 1, %v58_v48 }
   0x5   :  { %1513 = vmatpush1.bf16.msra.mxu1 %v1512_v8  ;;  %v1893_v17 = vpack.c.bf16 %v226_v14, %v224_v12  ;;  %v228_v18 = vld [vmem:[%s2266_s3 + $0x28] sm:$0xff]  ;;  %v1901_v20 = vpack.c.bf16 %v225_v16, %v223_v15  ;;  %v230_v21 = vld [vmem:[%s2266_s3 + $0x38] sm:$0xff]  ;;  %v227_v23 = vld [vmem:[%s2266_s3 + $0x20] sm:$0xff] }
   0x6   :  { %1515 = vmatprep.subr.bf16.mxu1 %v1514_v9  ;;  %v54_v19 = vld [vmem:[%s2265_s1 + $0x48] sm:$0xff]  ;;  %v1906_v22 = vpack.c.bf16 %v230_v21, %v228_v18  ;;  %v229_v24 = vld [vmem:[%s2266_s3 + $0x30] sm:$0xff]  ;;  %v53_v25 = vld [vmem:[%s2265_s1 + $0x40] sm:$0xff] }
   0x7   :  { %1535 = vmatprep.subr.bf16.mxu0 %v1893_v17  ;;  %v37_v26 = vld [vmem:[%s2267_s0] sm:$0xff]  ;;  %v1923_v27 = vpack.c.bf16 %v229_v24, %v227_v23  ;;  %v232_v28 = vld [vmem:[%s2266_s3 + $0x48] sm:$0xff]  ;;  %v234_v29 = vld [vmem:[%s2266_s3 + $0x58] sm:$0xff] }
   0x8   :  { %1537 = vmatpush1.bf16.msra.mxu0 %v1901_v20  ;;  %v231_v30 = vld [vmem:[%s2266_s3 + $0x40] sm:$0xff]  ;;  %v233_v31 = vld [vmem:[%s2266_s3 + $0x50] sm:$0xff]  ;;  %v236_v32 = vld [vmem:[%s2266_s3 + $0x68] sm:$0xff]  ;;  %v1946_v34 = vpack.c.bf16 %v234_v29, %v232_v28 }
   0x9   :  { %1517 = vmatpush1.bf16.msra.mxu1 %v1516_v13  ;;  %1539 = vmatprep.subr.bf16.mxu0 %v1906_v22  ;;  %v238_v33 = vld [vmem:[%s2266_s3 + $0x78] sm:$0xff]  ;;  %v38_v35 = vld [vmem:[%s2267_s0 + $0x8] sm:$0xff]  ;;  %v1953_v36 = vpack.c.bf16 %v233_v31, %v231_v30  ;;  %v235_v38 = vld [vmem:[%s2266_s3 + $0x60] sm:$0xff] }
   0xa   :  { %100 = vmatprep.subr.mxu1 %v54_v19  ;;  %v1956_v37 = vpack.c.bf16 %v238_v33, %v236_v32  ;;  %v237_v39 = vld [vmem:[%s2266_s3 + $0x70] sm:$0xff]  ;;  %v40_v42 = vld [vmem:[%s2267_s0 + $0x18] sm:$0xff]  ;;  %v41_v43 = vld [vmem:[%s2267_s0 + $0x20] sm:$0xff] }
   0xb   :  { %v39_v40 = vld [vmem:[%s2267_s0 + $0x10] sm:$0xff]  ;;  %v1973_v41 = vpack.c.bf16 %v237_v39, %v235_v38  ;;  %v42_v44 = vld [vmem:[%s2267_s0 + $0x28] sm:$0xff]  ;;  %v44_v46 = vld [vmem:[%s2267_s0 + $0x38] sm:$0xff] }
   0xc   :  { %1541 = vmatpush1.bf16.msra.mxu0 %v1923_v27  ;;  %v43_v45 = vld [vmem:[%s2267_s0 + $0x30] sm:$0xff]  ;;  %v55_v50 = vld [vmem:[%s2268_s2] sm:$0x3]  ;;  %s1797_s0 = smov 64  }
   0xd   :  { %101 = vmatpush1.msra.mxu1 %v53_v25  ;;  %1543 = vmatprep.subr.bf16.mxu0 %v1946_v34  ;;  %v60_v52 = vrot.slane %v55_v50, %v59_v49  ;;  %v64_v53 = vrot.slane %v55_v50, %v63_v51 }
   0xe   :  { %1377 = vmatmul.mubr.msk.f32.vlgmr.msra.gmra.mrb[0].mxu1 %vm67_vm0, %v37_v26  ;;  %1519 = vmatprep.subr.bf16.mxu1 %v1893_v17 }
   0xf   :  { %1521 = vmatpush1.bf16.msra.mxu1 %v1901_v20  ;;  %162 = vmatprep.mubr.f32.mxu1 %v1796_v3 }
  0x10   :  { %1523 = vmatprep.subr.bf16.mxu1 %v1906_v22  ;;  %1545 = vmatpush1.bf16.msra.mxu0 %v1953_v36 }
  0x11   :  { %1547 = vmatprep.subr.bf16.mxu0 %v1956_v37 }
  0x12   :  { %1378 = vmatmul.mubr.msk.f32.gmra.mrb[2].mxu1 %vm67_vm0, %v38_v35 }
  0x13   :  { %168 = vmatprep.mubr.f32.mxu1 %v1796_v3  ;;  %1525 = vmatpush1.bf16.msra.mxu1 %v1923_v27 }
  0x14   :  { %1527 = vmatprep.subr.bf16.mxu1 %v1946_v34  ;;  %1549 = vmatpush1.bf16.msra.mxu0 %v1973_v41 }
  0x15   :  { %1551 = vmatprep.subr.bf16.mxu0 %v1893_v17 }
  0x16   :  { %1379 = vmatmul.mubr.msk.f32.gmra.mrb[4].mxu1 %vm67_vm0, %v39_v40 }
  0x17   :  { %174 = vmatprep.mubr.f32.mxu1 %v1796_v3  ;;  %1529 = vmatpush1.bf16.msra.mxu1 %v1953_v36 }
  0x18   :  { %1531 = vmatprep.subr.bf16.mxu1 %v1956_v37 }
  0x1a   :  { %1380 = vmatmul.mubr.msk.f32.gmra.mrb[6].mxu1 %vm67_vm0, %v40_v42 }
  0x1b   :  { %180 = vmatprep.mubr.f32.mxu1 %v1796_v3  ;;  %1533 = vmatpush1.bf16.msra.mxu1 %v1973_v41 }
  0x1e   :  { %1381 = vmatmul.mubr.msk.f32.gmra.mrb[8].mxu1 %vm67_vm0, %v41_v43 }
  0x1f   :  { %186 = vmatprep.mubr.f32.mxu1 %v1796_v3 }
  0x22   :  { %1382 = vmatmul.mubr.msk.f32.gmra.mrb[10].mxu1 %vm67_vm0, %v42_v44 }
  0x23   :  { %192 = vmatprep.mubr.f32.mxu1 %v1796_v3 }
  0x26   :  { %1383 = vmatmul.mubr.msk.f32.gmra.mrb[12].mxu1 %vm67_vm0, %v43_v45 }
  0x27   :  { %198 = vmatprep.mubr.f32.mxu1 %v1796_v3 }
  0x2a   :  { %1384 = vmatmul.mubr.msk.f32.gmra.mrb[14].mxu1 %vm67_vm0, %v44_v46 }
  0x2b   :  { %307 = vmatprep.mubr.f32.mxu1 %v1796_v3 }
  0x2e   :  { %308 = vmatmul.mubr.f32.vlgmr.msra.gmra.mrb[0].mxu1 %v1796_v3 }
  0x2f   :  { %1450 = vmatprep.mubr.msk.f32.mxu1 %vm1799_vm2, %v1796_v3 }
  0xe5   :  { %v164_v54 = vpop.f32.mrb[2].mxu1 }
  0xe6   :  { %v2012_v55 = vadd.f32 %v164_v54, %v60_v52  ;;  %v166_v56 = vpop.f32.mrb[3].mxu1 }
  0xe7   :  { %v2014_v57 = vadd.f32 %v166_v56, %v64_v53 }
  0xe9   :  { %v170_v58 = vpop.f32.mrb[4].mxu1 }
  0xea   :  { %v2016_v59 = vadd.f32 %v170_v58, %v60_v52  ;;  %v172_v60 = vpop.f32.mrb[5].mxu1 }
  0xeb   :  { %v2018_v61 = vadd.f32 %v172_v60, %v64_v53 }
  0xed   :  { %v176_v62 = vpop.f32.mrb[6].mxu1 }
  0xee   :  { %v2020_v63 = vadd.f32 %v176_v62, %v60_v52  ;;  %v178_v0 = vpop.f32.mrb[7].mxu1 }
  0xef   :  { %v2022_v1 = vadd.f32 %v178_v0, %v64_v53 }
  0xf1   :  { %v182_v2 = vpop.f32.mrb[8].mxu1 }
  0xf2   :  { %v2024_v4 = vadd.f32 %v182_v2, %v60_v52  ;;  %v184_v5 = vpop.f32.mrb[9].mxu1 }
  0xf3   :  { %v2026_v6 = vadd.f32 %v184_v5, %v64_v53 }
  0xf5   :  { %v188_v7 = vpop.f32.mrb[10].mxu1 }
  0xf6   :  { %v2028_v8 = vadd.f32 %v188_v7, %v60_v52  ;;  %v190_v9 = vpop.f32.mrb[11].mxu1 }
  0xf7   :  { %v2030_v10 = vadd.f32 %v190_v9, %v64_v53 }
  0xf9   :  { %v194_v11 = vpop.f32.mrb[12].mxu1 }
  0xfa   :  { %v2032_v12 = vadd.f32 %v194_v11, %v60_v52  ;;  %v196_v13 = vpop.f32.mrb[13].mxu1 }
  0xfb   :  { %v2034_v14 = vadd.f32 %v196_v13, %v64_v53 }
  0xfd   :  { %v200_v15 = vpop.f32.mrb[14].mxu1 }
  0xfe   :  { %v2036_v16 = vadd.f32 %v200_v15, %v60_v52  ;;  %v202_v18 = vpop.f32.mrb[15].mxu1 }
  0xff   :  { %v2038_v19 = vadd.f32 %v202_v18, %v64_v53 }
 0x101   :  { %v309_v21 = vpop.f32.mrb[0].mxu1 }
 0x102   :  { %v1694_v23 = vadd.f32 %v309_v21, %v60_v52  ;;  %v311_v24 = vpop.f32.mrb[1].mxu1 }
 0x103   :  { %v1695_v26 = vadd.f32 %v311_v24, %v64_v53 }
 0x104   :  { %v316_v25 = vmul.f32 0.5, %v1694_v23 }
 0x105   :  { %v321_v33 = vmul.f32 0.5, %v1695_v26 }
 0x106   :  { %1730 = vtanh.f32 %v316_v25 }
 0x107   :  { %1732 = vtanh.f32 %v1695_v26 }
 0x108   :  { %1734 = vtanh.f32 %v321_v33 }
 0x110   :  { %v1731_v28 = vpop.eup %1730 }
 0x111   :  { %v318_v29 = vmul.f32 0.5, %v1731_v28  ;;  %v1733_v31 = vpop.eup %1732 }
 0x112   :  { %v1735_v40 = vpop.eup %1734 }
 0x113   :  { %v319_v30 = vadd.f32 0.5, %v318_v29  ;;  %v323_v42 = vmul.f32 0.5, %v1735_v40 }
 0x115   :  { %v326_v32 = vmul.f32 %v1733_v31, %v319_v30  ;;  %v325_v35 = vmul.f32 0.0, %v319_v30  ;;  %v324_v43 = vadd.f32 0.5, %v323_v42 }
 0x117   :  { %328 = vrot.lane.b32.xlu0 %v326_v32, %s1797_s0 }
 0x189   :  { %v329_v38 = vpop.permute.xlu0 %328 }
 0x18a   :  { %v331_v39 = vadd.f32 %v329_v38, %v325_v35 }
 0x18c   :  { %1736 = vtanh.f32 %v331_v39 }
 0x196   :  { %v1737_v44 = vpop.eup %1736 }
 0x197   :  { %v333_v45 = vmul.f32 %v1737_v44, %v324_v43 }
 0x199   :  { %337 = vrot.lane.b32.xlu0 %v333_v45, %s1797_s0 }
 0x20b   :  { %v338_v46 = vpop.permute.xlu0 %337 }
 0x20c   :  { %1385 = vmatmul.mubr.msk.f32.vlgmr.msra.gmra.mrb[0].mxu0 %vm239_vm1, %v338_v46 }
 0x20d   :  { %1553 = vmatpush1.bf16.msra.mxu0 %v1901_v20  ;;  %503 = vmatprep.mubr.f32.mxu0 %v1796_v3 }
 0x20e   :  { %1555 = vmatprep.subr.bf16.mxu0 %v1906_v22 }
 0x211   :  { %1557 = vmatpush1.bf16.msra.mxu0 %v1923_v27 }
 0x212   :  { %1559 = vmatprep.subr.bf16.mxu0 %v1946_v34 }
 0x215   :  { %1561 = vmatpush1.bf16.msra.mxu0 %v1953_v36 }
 0x216   :  { %1563 = vmatprep.subr.bf16.mxu0 %v1956_v37 }
 0x219   :  { %1565 = vmatpush1.bf16.msra.mxu0 %v1973_v41 }
 0x21a   :  { %1567 = vmatprep.subr.bf16.mxu0 %v1893_v17 }
 0x2df   :  { %v407_v47 = vpop.f32.mrb[0].mxu0 }
 0x2e0   :  { %v412_v48 = vadd.f32 %v407_v47, %v2012_v55  ;;  %v409_v49 = vpop.f32.mrb[1].mxu0 }
 0x2e1   :  { %v413_v50 = vadd.f32 %v409_v49, %v2014_v57 }
 0x2e2   :  { %v414_v51 = vmul.f32 0.5, %v412_v48 }
 0x2e3   :  { %v419_v60 = vmul.f32 0.5, %v413_v50 }
 0x2e4   :  { %1738 = vtanh.f32 %v414_v51 }
 0x2e5   :  { %1740 = vtanh.f32 %v413_v50 }
 0x2e6   :  { %1742 = vtanh.f32 %v419_v60 }
 0x2ee   :  { %v1739_v52 = vpop.eup %1738 }
 0x2ef   :  { %v416_v53 = vmul.f32 0.5, %v1739_v52  ;;  %v1741_v56 = vpop.eup %1740 }
 0x2f0   :  { %v1743_v55 = vpop.eup %1742 }
 0x2f1   :  { %v417_v54 = vadd.f32 0.5, %v416_v53  ;;  %v421_v5 = vmul.f32 0.5, %v1743_v55 }
 0x2f3   :  { %v424_v58 = vmul.f32 %v1741_v56, %v417_v54  ;;  %v423_v62 = vmul.f32 %v417_v54, %v331_v39  ;;  %v422_v7 = vadd.f32 0.5, %v421_v5 }
 0x2f5   :  { %426 = vrot.lane.b32.xlu1 %v424_v58, %s1797_s0 }
 0x367   :  { %v427_v0 = vpop.permute.xlu1 %426 }
 0x368   :  { %v429_v2 = vadd.f32 %v427_v0, %v423_v62 }
 0x36a   :  { %1744 = vtanh.f32 %v429_v2 }
 0x374   :  { %v1745_v57 = vpop.eup %1744 }
 0x375   :  { %v431_v9 = vmul.f32 %v1745_v57, %v422_v7 }
 0x377   :  { %435 = vrot.lane.b32.xlu1 %v431_v9, %s1797_s0 }
 0x3e9   :  { %v436_v11 = vpop.permute.xlu1 %435 }
 0x3ea   :  { %1386 = vmatmul.mubr.msk.f32.vlgmr.msra.gmra.mrb[2].mxu0 %vm239_vm1, %v436_v11 }
 0x3eb   :  { %1569 = vmatpush1.bf16.msra.mxu0 %v1901_v20  ;;  %601 = vmatprep.mubr.f32.mxu0 %v1796_v3 }
 0x3ec   :  { %1571 = vmatprep.subr.bf16.mxu0 %v1906_v22 }
 0x3ef   :  { %1573 = vmatpush1.bf16.msra.mxu0 %v1923_v27 }
 0x3f0   :  { %1575 = vmatprep.subr.bf16.mxu0 %v1946_v34 }
 0x3f3   :  { %1577 = vmatpush1.bf16.msra.mxu0 %v1953_v36 }
 0x3f4   :  { %1579 = vmatprep.subr.bf16.mxu0 %v1956_v37 }
 0x3f7   :  { %1581 = vmatpush1.bf16.msra.mxu0 %v1973_v41 }
 0x3f8   :  { %1583 = vmatprep.subr.bf16.mxu0 %v1893_v17 }
 0x4bd   :  { %v505_v13 = vpop.f32.mrb[2].mxu0 }
 0x4be   :  { %v510_v15 = vadd.f32 %v505_v13, %v2016_v59  ;;  %v507_v18 = vpop.f32.mrb[3].mxu0 }
 0x4bf   :  { %v511_v21 = vadd.f32 %v507_v18, %v2018_v61 }
 0x4c0   :  { %v512_v23 = vmul.f32 0.5, %v510_v15 }
 0x4c1   :  { %v517_v30 = vmul.f32 0.5, %v511_v21 }
 0x4c2   :  { %1746 = vtanh.f32 %v512_v23 }
 0x4c3   :  { %1748 = vtanh.f32 %v511_v21 }
 0x4c4   :  { %1750 = vtanh.f32 %v517_v30 }
 0x4cc   :  { %v1747_v24 = vpop.eup %1746 }
 0x4cd   :  { %v514_v25 = vmul.f32 0.5, %v1747_v24  ;;  %v1749_v28 = vpop.eup %1748 }
 0x4ce   :  { %v1751_v59 = vpop.eup %1750 }
 0x4cf   :  { %v515_v26 = vadd.f32 0.5, %v514_v25  ;;  %v519_v35 = vmul.f32 0.5, %v1751_v59 }
 0x4d1   :  { %v522_v29 = vmul.f32 %v1749_v28, %v515_v26  ;;  %v521_v31 = vmul.f32 %v515_v26, %v429_v2  ;;  %v520_v38 = vadd.f32 0.5, %v519_v35 }
 0x4d3   :  { %524 = vrot.lane.b32.xlu0 %v522_v29, %s1797_s0 }
 0x545   :  { %v525_v32 = vpop.permute.xlu0 %524 }
 0x546   :  { %v527_v33 = vadd.f32 %v525_v32, %v521_v31 }
 0x548   :  { %1752 = vtanh.f32 %v527_v33 }
 0x552   :  { %v1753_v61 = vpop.eup %1752 }
 0x553   :  { %v529_v39 = vmul.f32 %v1753_v61, %v520_v38 }
 0x555   :  { %533 = vrot.lane.b32.xlu1 %v529_v39, %s1797_s0 }
 0x5c7   :  { %v534_v40 = vpop.permute.xlu1 %533 }
 0x5c8   :  { %1387 = vmatmul.mubr.msk.f32.vlgmr.msra.gmra.mrb[4].mxu0 %vm239_vm1, %v534_v40 }
 0x5c9   :  { %1585 = vmatpush1.bf16.msra.mxu0 %v1901_v20  ;;  %699 = vmatprep.mubr.f32.mxu0 %v1796_v3 }
 0x5ca   :  { %1587 = vmatprep.subr.bf16.mxu0 %v1906_v22 }
 0x5cd   :  { %1589 = vmatpush1.bf16.msra.mxu0 %v1923_v27 }
 0x5ce   :  { %1591 = vmatprep.subr.bf16.mxu0 %v1946_v34 }
 0x5d1   :  { %1593 = vmatpush1.bf16.msra.mxu0 %v1953_v36 }
 0x5d2   :  { %1595 = vmatprep.subr.bf16.mxu0 %v1956_v37 }
 0x5d5   :  { %1597 = vmatpush1.bf16.msra.mxu0 %v1973_v41 }
 0x5d6   :  { %1599 = vmatprep.subr.bf16.mxu0 %v1893_v17 }
 0x69b   :  { %v603_v42 = vpop.f32.mrb[4].mxu0 }
 0x69c   :  { %v608_v43 = vadd.f32 %v603_v42, %v2020_v63  ;;  %v605_v44 = vpop.f32.mrb[5].mxu0 }
 0x69d   :  { %v609_v45 = vadd.f32 %v605_v44, %v2022_v1 }
 0x69e   :  { %v610_v46 = vmul.f32 0.5, %v608_v43 }
 0x69f   :  { %v615_v52 = vmul.f32 0.5, %v609_v45 }
 0x6a0   :  { %1754 = vtanh.f32 %v610_v46 }
 0x6a1   :  { %1756 = vtanh.f32 %v609_v45 }
 0x6a2   :  { %1758 = vtanh.f32 %v615_v52 }
 0x6aa   :  { %v1755_v47 = vpop.eup %1754 }
 0x6ab   :  { %v612_v48 = vmul.f32 0.5, %v1755_v47  ;;  %v1757_v50 = vpop.eup %1756 }
 0x6ac   :  { %v1759_v63 = vpop.eup %1758 }
 0x6ad   :  { %v613_v49 = vadd.f32 0.5, %v612_v48  ;;  %v617_v58 = vmul.f32 0.5, %v1759_v63 }
 0x6af   :  { %v620_v51 = vmul.f32 %v1757_v50, %v613_v49  ;;  %v619_v53 = vmul.f32 %v613_v49, %v527_v33  ;;  %v618_v60 = vadd.f32 0.5, %v617_v58 }
 0x6b1   :  { %622 = vrot.lane.b32.xlu0 %v620_v51, %s1797_s0 }
 0x723   :  { %v623_v54 = vpop.permute.xlu0 %622 }
 0x724   :  { %v625_v56 = vadd.f32 %v623_v54, %v619_v53 }
 0x726   :  { %1760 = vtanh.f32 %v625_v56 }
 0x730   :  { %v1761_v1 = vpop.eup %1760 }
 0x731   :  { %v627_v62 = vmul.f32 %v1761_v1, %v618_v60 }
 0x733   :  { %631 = vrot.lane.b32.xlu1 %v627_v62, %s1797_s0 }
 0x7a5   :  { %v632_v0 = vpop.permute.xlu1 %631 }
 0x7a6   :  { %1388 = vmatmul.mubr.msk.f32.vlgmr.msra.gmra.mrb[6].mxu0 %vm239_vm1, %v632_v0 }
 0x7a7   :  { %1601 = vmatpush1.bf16.msra.mxu0 %v1901_v20  ;;  %797 = vmatprep.mubr.f32.mxu0 %v1796_v3 }
 0x7a8   :  { %1603 = vmatprep.subr.bf16.mxu0 %v1906_v22 }
 0x7ab   :  { %1605 = vmatpush1.bf16.msra.mxu0 %v1923_v27 }
 0x7ac   :  { %1607 = vmatprep.subr.bf16.mxu0 %v1946_v34 }
 0x7af   :  { %1609 = vmatpush1.bf16.msra.mxu0 %v1953_v36 }
 0x7b0   :  { %1611 = vmatprep.subr.bf16.mxu0 %v1956_v37 }
 0x7b3   :  { %1613 = vmatpush1.bf16.msra.mxu0 %v1973_v41 }
 0x7b4   :  { %1615 = vmatprep.subr.bf16.mxu0 %v1893_v17 }
 0x879   :  { %v701_v2 = vpop.f32.mrb[6].mxu0 }
 0x87a   :  { %v706_v55 = vadd.f32 %v701_v2, %v2024_v4  ;;  %v703_v5 = vpop.f32.mrb[7].mxu0 }
 0x87b   :  { %v707_v7 = vadd.f32 %v703_v5, %v2026_v6 }
 0x87c   :  { %v708_v57 = vmul.f32 0.5, %v706_v55 }
 0x87d   :  { %v713_v21 = vmul.f32 0.5, %v707_v7 }
 0x87e   :  { %1762 = vtanh.f32 %v708_v57 }
 0x87f   :  { %1764 = vtanh.f32 %v707_v7 }
 0x880   :  { %1766 = vtanh.f32 %v713_v21  ;;  %v1030_v21 = vld [vmem:[%s2269_s5 + $0x10] sm:$0xff] }
 0x888   :  { %v1763_v9 = vpop.eup %1762 }
 0x889   :  { %v710_v11 = vmul.f32 0.5, %v1763_v9  ;;  %v1765_v15 = vpop.eup %1764 }
 0x88a   :  { %v1767_v4 = vpop.eup %1766 }
 0x88b   :  { %v711_v13 = vadd.f32 0.5, %v710_v11  ;;  %v715_v26 = vmul.f32 0.5, %v1767_v4  ;;  %v1032_v4 = vld [vmem:[%s2269_s5 + $0x20] sm:$0xff] }
 0x88d   :  { %v718_v18 = vmul.f32 %v1765_v15, %v711_v13  ;;  %v717_v23 = vmul.f32 %v711_v13, %v625_v56  ;;  %v716_v28 = vadd.f32 0.5, %v715_v26  ;;  %v1033_v26 = vld [vmem:[%s2269_s5 + $0x28] sm:$0xff] }
 0x88f   :  { %720 = vrot.lane.b32.xlu0 %v718_v18, %s1797_s0  ;;  %v1798_v18 = vmov 0.0|0.0  }
 0x890   :  { %1646 = vmatprep.subr.bf16.mxu1 %v1798_v18 }
 0x901   :  { %v721_v24 = vpop.permute.xlu0 %720 }
 0x902   :  { %v723_v25 = vadd.f32 %v721_v24, %v717_v23  ;;  %v1031_v24 = vld [vmem:[%s2269_s5 + $0x18] sm:$0xff] }
 0x904   :  { %1768 = vtanh.f32 %v723_v25 }
 0x90e   :  { %v1769_v6 = vpop.eup %1768 }
 0x90f   :  { %v725_v29 = vmul.f32 %v1769_v6, %v716_v28  ;;  %v1653_v28 = vpack.c.bf16 %v1033_v26, %v1032_v4  ;;  %v1034_v6 = vld [vmem:[%s2269_s5 + $0x30] sm:$0xff] }
 0x911   :  { %729 = vrot.lane.b32.xlu1 %v725_v29, %s1797_s0  ;;  %v1035_v29 = vld [vmem:[%s2269_s5 + $0x38] sm:$0xff] }
 0x983   :  { %v730_v30 = vpop.permute.xlu1 %729 }
 0x984   :  { %1389 = vmatmul.mubr.msk.f32.vlgmr.msra.gmra.mrb[8].mxu0 %vm239_vm1, %v730_v30  ;;  %v1656_v30 = vpack.c.bf16 %v1035_v29, %v1034_v6 }
 0x985   :  { %1617 = vmatpush1.bf16.msra.mxu0 %v1901_v20  ;;  %895 = vmatprep.mubr.f32.mxu0 %v1796_v3 }
 0x986   :  { %1619 = vmatprep.subr.bf16.mxu0 %v1906_v22 }
 0x989   :  { %1621 = vmatpush1.bf16.msra.mxu0 %v1923_v27 }
 0x98a   :  { %1623 = vmatprep.subr.bf16.mxu0 %v1946_v34 }
 0x98d   :  { %1625 = vmatpush1.bf16.msra.mxu0 %v1953_v36 }
 0x98e   :  { %1627 = vmatprep.subr.bf16.mxu0 %v1956_v37 }
 0x991   :  { %1629 = vmatpush1.bf16.msra.mxu0 %v1973_v41 }
 0x992   :  { %1631 = vmatprep.subr.bf16.mxu0 %v1893_v17 }
 0xa57   :  { %v799_v31 = vpop.f32.mrb[8].mxu0 }
 0xa58   :  { %v804_v32 = vadd.f32 %v799_v31, %v2028_v8  ;;  %v801_v33 = vpop.f32.mrb[9].mxu0 }
 0xa59   :  { %v805_v59 = vadd.f32 %v801_v33, %v2030_v10 }
 0xa5a   :  { %v806_v35 = vmul.f32 0.5, %v804_v32 }
 0xa5b   :  { %v811_v43 = vmul.f32 0.5, %v805_v59 }
 0xa5c   :  { %1770 = vtanh.f32 %v806_v35 }
 0xa5d   :  { %1772 = vtanh.f32 %v805_v59 }
 0xa5e   :  { %1774 = vtanh.f32 %v811_v43 }
 0xa66   :  { %v1771_v38 = vpop.eup %1770 }
 0xa67   :  { %v808_v61 = vmul.f32 0.5, %v1771_v38  ;;  %v1773_v40 = vpop.eup %1772 }
 0xa68   :  { %v1775_v8 = vpop.eup %1774 }
 0xa69   :  { %v809_v39 = vadd.f32 0.5, %v808_v61  ;;  %v813_v46 = vmul.f32 0.5, %v1775_v8  ;;  %v1022_v8 = vld [vmem:[%s2270_s4 + $0x10] sm:$0xff] }
 0xa6b   :  { %v816_v42 = vmul.f32 %v1773_v40, %v809_v39  ;;  %v815_v44 = vmul.f32 %v809_v39, %v723_v25  ;;  %v814_v47 = vadd.f32 0.5, %v813_v46  ;;  %v1650_v25 = vpack.c.bf16 %v1031_v24, %v1030_v21  ;;  %v1023_v46 = vld [vmem:[%s2270_s4 + $0x18] sm:$0xff] }
 0xa6d   :  { %818 = vrot.lane.b32.xlu0 %v816_v42, %s1797_s0 }
 0xadf   :  { %v819_v17 = vpop.permute.xlu0 %818 }
 0xae0   :  { %v821_v45 = vadd.f32 %v819_v17, %v815_v44  ;;  %v1020_v44 = vld [vmem:[%s2270_s4] sm:$0xff]  ;;  %v1021_v17 = vld [vmem:[%s2270_s4 + $0x8] sm:$0xff] }
 0xae2   :  { %1776 = vtanh.f32 %v821_v45 }
 0xaec   :  { %v1777_v10 = vpop.eup %1776 }
 0xaed   :  { %v823_v48 = vmul.f32 %v1777_v10, %v814_v47  ;;  %v1662_v10 = vpack.c.bf16 %v1023_v46, %v1022_v8 }
 0xaef   :  { %827 = vrot.lane.b32.xlu1 %v823_v48, %s1797_s0  ;;  %v1024_v48 = vld [vmem:[%s2270_s4 + $0x20] sm:$0xff] }
 0xb61   :  { %v828_v49 = vpop.permute.xlu1 %827 }
 0xb62   :  { %1390 = vmatmul.mubr.msk.f32.vlgmr.msra.gmra.mrb[10].mxu0 %vm239_vm1, %v828_v49  ;;  %v1025_v49 = vld [vmem:[%s2270_s4 + $0x28] sm:$0xff] }
 0xb63   :  { %1633 = vmatpush1.bf16.msra.mxu0 %v1901_v20  ;;  %993 = vmatprep.mubr.f32.mxu0 %v1796_v3 }
 0xb64   :  { %1635 = vmatprep.subr.bf16.mxu0 %v1906_v22 }
 0xb67   :  { %1637 = vmatpush1.bf16.msra.mxu0 %v1923_v27 }
 0xb68   :  { %1639 = vmatprep.subr.bf16.mxu0 %v1946_v34 }
 0xb6b   :  { %1641 = vmatpush1.bf16.msra.mxu0 %v1953_v36 }
 0xb6c   :  { %1643 = vmatprep.subr.bf16.mxu0 %v1956_v37 }
 0xb6f   :  { %1645 = vmatpush1.bf16.msra.mxu0 %v1973_v41 }
 0xc35   :  { %v897_v50 = vpop.f32.mrb[10].mxu0 }
 0xc36   :  { %v902_v51 = vadd.f32 %v897_v50, %v2032_v12  ;;  %v899_v52 = vpop.f32.mrb[11].mxu0  ;;  %v1665_v50 = vpack.c.bf16 %v1025_v49, %v1024_v48 }
 0xc37   :  { %v903_v20 = vadd.f32 %v899_v52, %v2034_v14  ;;  %v1027_v52 = vld [vmem:[%s2270_s4 + $0x38] sm:$0xff] }
 0xc38   :  { %v904_v53 = vmul.f32 0.5, %v902_v51  ;;  %v1026_v51 = vld [vmem:[%s2270_s4 + $0x30] sm:$0xff] }
 0xc39   :  { %v909_v36 = vmul.f32 0.5, %v903_v20 }
 0xc3a   :  { %1778 = vtanh.f32 %v904_v53  ;;  %v1186_v53 = vld [vmem:[%s2271_s6] sm:$0xff] }
 0xc3b   :  { %1780 = vtanh.f32 %v903_v20  ;;  %v1668_v20 = vpack.c.bf16 %v1027_v52, %v1026_v51 }
 0xc3c   :  { %1782 = vtanh.f32 %v909_v36 }
 0xc44   :  { %v1779_v22 = vpop.eup %1778 }
 0xc45   :  { %v906_v54 = vmul.f32 0.5, %v1779_v22  ;;  %v1781_v56 = vpop.eup %1780  ;;  %v1187_v22 = vld [vmem:[%s2271_s6 + $0x8] sm:$0xff] }
 0xc46   :  { %v1783_v12 = vpop.eup %1782 }
 0xc47   :  { %v907_v27 = vadd.f32 0.5, %v906_v54  ;;  %v911_v58 = vmul.f32 0.5, %v1783_v12  ;;  %v1671_v54 = vpack.c.bf16 %v1187_v22, %v1186_v53  ;;  %v1192_v12 = vld [vmem:[%s2271_s6 + $0x30] sm:$0xff] }
 0xc49   :  { %v914_v34 = vmul.f32 %v1781_v56, %v907_v27  ;;  %v913_v37 = vmul.f32 %v907_v27, %v821_v45  ;;  %v912_v60 = vadd.f32 0.5, %v911_v58  ;;  %v1659_v45 = vpack.c.bf16 %v1021_v17, %v1020_v44  ;;  %v1188_v27 = vld [vmem:[%s2271_s6 + $0x10] sm:$0xff]  ;;  %v1189_v56 = vld [vmem:[%s2271_s6 + $0x18] sm:$0xff] }
 0xc4a   :  { %v1674_v36 = vpack.c.bf16 %v1189_v56, %v1188_v27  ;;  %v1193_v58 = vld [vmem:[%s2271_s6 + $0x38] sm:$0xff] }
 0xc4b   :  { %916 = vrot.lane.b32.xlu0 %v914_v34, %s1797_s0 }
 0xcbd   :  { %v917_v41 = vpop.permute.xlu0 %916 }
 0xcbe   :  { %v919_v63 = vadd.f32 %v917_v41, %v913_v37  ;;  %v1190_v37 = vld [vmem:[%s2271_s6 + $0x20] sm:$0xff]  ;;  %v1191_v41 = vld [vmem:[%s2271_s6 + $0x28] sm:$0xff] }
 0xcc0   :  { %1784 = vtanh.f32 %v919_v63 }
 0xcca   :  { %v1785_v14 = vpop.eup %1784 }
 0xccb   :  { %v921_v1 = vmul.f32 %v1785_v14, %v912_v60  ;;  %v1680_v60 = vpack.c.bf16 %v1193_v58, %v1192_v12 }
 0xccd   :  { %925 = vrot.lane.b32.xlu1 %v921_v1, %s1797_s0  ;;  %v1279_v1 = vld [vmem:[%s2272_s8] sm:$0xff] }
 0xd3f   :  { %v926_v62 = vpop.permute.xlu1 %925 }
 0xd40   :  { %1391 = vmatmul.mubr.msk.f32.vlgmr.msra.gmra.mrb[12].mxu0 %vm239_vm1, %v926_v62  ;;  %v1280_v62 = vld [vmem:[%s2272_s8 + $0x8] sm:$0xff] }
 0xe13   :  { %v995_v0 = vpop.f32.mrb[12].mxu0 }
 0xe14   :  { %v1000_v2 = vadd.f32 %v995_v0, %v2036_v16  ;;  %v997_v55 = vpop.f32.mrb[13].mxu0  ;;  %v1028_v16 = vld [vmem:[%s2269_s5] sm:$0xff]  ;;  %v1281_v0 = vld [vmem:[%s2272_s8 + $0x10] sm:$0xff] }
 0xe15   :  { %v1001_v5 = vadd.f32 %v997_v55, %v2038_v19  ;;  %v1029_v19 = vld [vmem:[%s2269_s5 + $0x8] sm:$0xff]  ;;  %v1282_v55 = vld [vmem:[%s2272_s8 + $0x18] sm:$0xff] }
 0xe16   :  { %v1002_v7 = vmul.f32 0.5, %v1000_v2  ;;  %v1647_v23 = vpack.c.bf16 %v1029_v19, %v1028_v16  ;;  %v1683_v2 = vpack.c.bf16 %v1280_v62, %v1279_v1 }
 0xe17   :  { %v1007_v31 = vmul.f32 0.5, %v1001_v5 }
 0xe18   :  { %1786 = vtanh.f32 %v1002_v7  ;;  %1648 = vmatpush3.bf16.msra.mxu1 %v1647_v23  ;;  %v1284_v7 = vld [vmem:[%s2272_s8 + $0x28] sm:$0xff] }
 0xe19   :  { %1788 = vtanh.f32 %v1001_v5  ;;  %1649 = vmatprep.subr.bf16.mxu1 %v1798_v18  ;;  %v1686_v5 = vpack.c.bf16 %v1282_v55, %v1281_v0 }
 0xe1a   :  { %1790 = vtanh.f32 %v1007_v31 }
 0xe1c   :  { %1651 = vmatpush3.bf16.msra.mxu1 %v1650_v25  ;;  %v1395_v25 = vld [vmem:[%s2274_s7] ss:$0 sm:$0xff] }
 0xe1d   :  { %1652 = vmatprep.subr.bf16.mxu1 %v1798_v18 }
 0xe20   :  { %1654 = vmatpush3.bf16.msra.mxu1 %v1653_v28 }
 0xe21   :  { %1655 = vmatprep.subr.bf16.mxu1 %v1798_v18 }
 0xe22   :  { %v1787_v57 = vpop.eup %1786 }
 0xe23   :  { %v1004_v9 = vmul.f32 0.5, %v1787_v57  ;;  %v1789_v13 = vpop.eup %1788 }
 0xe24   :  { %1657 = vmatpush3.bf16.msra.mxu1 %v1656_v30  ;;  %v1791_v35 = vpop.eup %1790 }
 0xe25   :  { %v1005_v11 = vadd.f32 0.5, %v1004_v9  ;;  %1658 = vmatprep.subr.bf16.mxu1 %v1798_v18  ;;  %v1009_v38 = vmul.f32 0.5, %v1791_v35  ;;  %v1285_v9 = vld [vmem:[%s2272_s8 + $0x30] sm:$0xff] }
 0xe27   :  { %v1012_v15 = vmul.f32 %v1789_v13, %v1005_v11  ;;  %v1011_v32 = vmul.f32 %v1005_v11, %v919_v63  ;;  %v1010_v61 = vadd.f32 0.5, %v1009_v38  ;;  %v1677_v63 = vpack.c.bf16 %v1191_v41, %v1190_v37  ;;  %v1286_v11 = vld [vmem:[%s2272_s8 + $0x38] sm:$0xff] }
 0xe28   :  { %v1692_v13 = vpack.c.bf16 %v1286_v11, %v1285_v9 }
 0xe29   :  { %1014 = vrot.lane.b32.xlu0 %v1012_v15, %s1797_s0  ;;  %v15_v15 = vstv %s2273_s9 }
 0xe2a   :  { %16 = vst [vmem:[#allocation3] sm:$0x1] %v15_v15 }
 0xe31   :  { %v1396_v29 = vld [vmem:[#allocation3] ss:$0 sm:$0xff] }
 0xe9b   :  { %v1015_v33 = vpop.permute.xlu0 %1014 }
 0xe9c   :  { %v1017_v59 = vadd.f32 %v1015_v33, %v1011_v32 }
 0xe9e   :  { %1792 = vtanh.f32 %v1017_v59 }
 0xea8   :  { %v1793_v39 = vpop.eup %1792 }
 0xea9   :  { %v1019_v40 = vmul.f32 %v1793_v39, %v1010_v61 }
 0xeab   :  { %1112 = vrot.lane.b32.xlu0 %v1019_v40, %s1797_s0  ;;  %v1037_v42 = vrot.slane %v1019_v40, 2  ;;  %v1194_v43 = vrot.slane %v1019_v40, 4 }
 0xead   :  { %1038 = vrot.lane.b32.xlu1 %v1037_v42, %s1797_s0 }
 0xeb1   :  { %1195 = vrot.lane.b32.xlu1 %v1194_v43, %s1797_s0 }
 0xf1d   :  { %v1113_v34 = vpop.permute.xlu0 %1112 }
 0xf1f   :  { %v1039_v47 = vpop.permute.xlu1 %1038 }
 0xf20   :  { %1451 = vmatmul.mubr.msk.f32.vlgmr.msra.gmra.mrb[16].mxu1 %vm239_vm1, %v1039_v47 }
 0xf21   :  { %1660 = vmatpush3.bf16.msra.mxu1 %v1659_v45  ;;  %1469 = vmatprep.mubr.msk.f32.mxu1 %vm1799_vm2, %v1796_v3 }
 0xf22   :  { %1661 = vmatprep.subr.bf16.mxu1 %v1798_v18 }
 0xf23   :  { %v1196_v14 = vpop.permute.xlu1 %1195 }
 0xf25   :  { %1663 = vmatpush3.bf16.msra.mxu1 %v1662_v10 }
 0xf26   :  { %1664 = vmatprep.subr.bf16.mxu1 %v1798_v18 }
 0xf29   :  { %1666 = vmatpush3.bf16.msra.mxu1 %v1665_v50 }
 0xf2a   :  { %1667 = vmatprep.subr.bf16.mxu1 %v1798_v18 }
 0xf2d   :  { %1669 = vmatpush3.bf16.msra.mxu1 %v1668_v20 }
 0xf2e   :  { %1670 = vmatprep.subr.bf16.mxu1 %v1798_v18 }
 0xf30   :  { %1470 = vmatmul.mubr.msk.f32.vlgmr.msra.gmra.mrb[18].mxu1 %vm239_vm1, %v1113_v34 }
 0xf31   :  { %1672 = vmatpush3.bf16.msra.mxu1 %v1671_v54  ;;  %1488 = vmatprep.mubr.msk.f32.mxu1 %vm1799_vm2, %v1796_v3 }
 0xf32   :  { %1673 = vmatprep.subr.bf16.mxu1 %v1798_v18 }
 0xf35   :  { %1675 = vmatpush3.bf16.msra.mxu1 %v1674_v36 }
 0xf36   :  { %1676 = vmatprep.subr.bf16.mxu1 %v1798_v18 }
 0xf39   :  { %1678 = vmatpush3.bf16.msra.mxu1 %v1677_v63 }
 0xf3a   :  { %1679 = vmatprep.subr.bf16.mxu1 %v1798_v18 }
 0xf3d   :  { %1681 = vmatpush3.bf16.msra.mxu1 %v1680_v60 }
 0xf3e   :  { %1682 = vmatprep.subr.bf16.mxu1 %v1798_v18 }
 0xf40   :  { %1489 = vmatmul.mubr.msk.f32.vlgmr.msra.gmra.mrb[20].mxu1 %vm239_vm1, %v1196_v14 }
 0xf41   :  { %1507 = vmatprep.mubr.msk.f32.mxu1 %vm1799_vm2, %v1796_v3  ;;  %1684 = vmatpush3.bf16.msra.mxu1 %v1683_v2  ;;  %v1283_v3 = vld [vmem:[%s2272_s8 + $0x20] sm:$0xff] }
 0xf42   :  { %1685 = vmatprep.subr.bf16.mxu1 %v1798_v18  ;;  %v1689_v57 = vpack.c.bf16 %v1284_v7, %v1283_v3 }
 0xf45   :  { %1687 = vmatpush3.bf16.msra.mxu1 %v1686_v5 }
 0xf46   :  { %1688 = vmatprep.subr.bf16.mxu1 %v1798_v18 }
 0xf49   :  { %1690 = vmatpush3.bf16.msra.mxu1 %v1689_v57 }
 0xf4a   :  { %1691 = vmatprep.subr.bf16.mxu1 %v1798_v18 }
 0xf4d   :  { %1693 = vmatpush3.bf16.msra.mxu1 %v1692_v13 }
 0xff3   :  { %v1108_v16 = vpop.f32.mrb[16].mxu1 }
 0xff4   :  { %v1452_v19 = vpop.f32.mrb[17].mxu1 }
0x1003   :  { %v1182_v21 = vpop.f32.mrb[18].mxu1 }
0x1004   :  { %v1183_v23 = vadd.f32 %v1182_v21, %v1108_v16  ;;  %v1471_v18 = vpop.f32.mrb[19].mxu1 }
0x1013   :  { %v1265_v24 = vpop.f32.mrb[20].mxu1 }
0x1014   :  { %v1269_v4 = vadd.f32 %v1265_v24, %v1183_v23  ;;  %v1490_v26 = vpop.f32.mrb[21].mxu1 }
0x1016   :  { %v1277_v28 = vadd.f32 %v1395_v25, %v1269_v4 }
0x1018   :  { %v1278_v6 = vmax.f32 %v1277_v28, 0.0 }
0x101a   :  { %1508 = vmatmul.mubr.msk.f32.vlgmr.msra.gmra.mrb[22].mxu1 %vm239_vm1, %v1278_v6 }
0x10ed   :  { %v1363_v30 = vpop.f32.mrb[22].mxu1 }
0x10ee   :  { %v1364_v31 = vadd.f32 %v1396_v29, %v1363_v30  ;;  %v1509_v32 = vpop.f32.mrb[23].mxu1 }
0x10f0   :  { %v1367_v33 = vmul.f32 0.5, %v1364_v31 }
0x10f2   :  { %1794 = vtanh.f32 %v1367_v33 }
0x10fc   :  { %v1795_v59 = vpop.eup %1794 }
0x10fd   :  { %v1369_v35 = vmul.f32 0.5, %v1795_v59 }
0x10ff   :  { %v1370_v38 = vadd.f32 0.5, %v1369_v35 }
0x1101   :  { %1372 = vst.msk [vmem:[%s2275_s10] sm:$0x3] %vm1371_vm3, %v1370_v38 }

</bundles_post_ra>
